<compile_context>
chip_gen: v5e
topology: v5e:2x2
jax: 0.10.0
libtpu: 0.0.40
codegen_flags: <defaults>
</compile_context>

<pallas_src>
import math
import functools

import jax
import jax.numpy as jnp
from jax import lax
from jax.experimental import pallas as pl
from jax.experimental.pallas import tpu as pltpu


# ----------------------------------------------------------------------------
# Fused MHA forward kernel (one grid step = one batch element x one row tile)
# ----------------------------------------------------------------------------
def _mha_fwd_kernel(
    q_ref, k_ref, v_ref,
    w1_ref, b1_ref, w2_ref, b2_ref, w3_ref, b3_ref,
    w4_ref, w4c_ref, b4_ref,
    wk_ref, bk_ref, wv_ref, bv_ref,
    o_ref,
    m_scr, n_scr, sb_scr,
    *, head, d_k, h_w, compute_dtype, approx_recip,
):
    f32 = jnp.float32
    cdt = compute_dtype
    dn0 = (((0,), (0,)), ((), ()))      # contract dim 0 of both operands (A^T @ B)

    # ------------------------------------------------------------- per batch --
    # Runs once per batch element (first row tile); results persist in VMEM
    # scratch and are reused by all row tiles of this batch element, so the
    # k/v projections are no longer recomputed per tile.
    @pl.when(pl.program_id(1) == 0)
    def _prepare_batch():
        b4v = b4_ref[...]                                      # (1, H) f32
        for h in range(head):
            r0, c0 = h * d_k, h * h_w
            # head-h row blocks of the k/v projections (row-block separable);
            # the 1/sqrt(d_k) attention scale is pre-folded into wk/bk.
            k_h = (jnp.dot(k_ref[r0:r0 + d_k, :].astype(cdt), wk_ref[...],
                           preferred_element_type=f32)
                   + bk_ref[...]).astype(cdt)                  # (d_k, h_w)
            v_h = (jnp.dot(v_ref[r0:r0 + d_k, :].astype(cdt), wv_ref[...],
                           preferred_element_type=f32)
                   + bv_ref[...]).astype(cdt)                  # (d_k, h_w)
            # score-side fold:  q_h @ k_h = x3 @ M_h + sb_h, with
            #   M_h  = w4[:, hd] @ k_h  (= w4c[hd, :]^T @ k_h)
            #   sb_h = b4[:, hd] @ k_h
            m_h = lax.dot_general(w4c_ref[r0:r0 + d_k, :], k_h, dn0,
                                  preferred_element_type=f32)  # (H, h_w)
            sb_h = jnp.dot(b4v[:, r0:r0 + d_k].astype(cdt), k_h,
                           preferred_element_type=f32)         # (1, h_w)
            # output-side fold:  (p_h @ v_h^T) @ w4[hd, :] = p_h @ N_h, with
            #   N_h = v_h^T @ w4[hd, :]
            n_h = lax.dot_general(v_h, w4_ref[r0:r0 + d_k, :], dn0,
                                  preferred_element_type=f32)  # (h_w, H)
            m_scr[:, c0:c0 + h_w] = m_h.astype(cdt)
            sb_scr[:, c0:c0 + h_w] = sb_h
            n_scr[c0:c0 + h_w, :] = n_h.astype(cdt)

    # -------------------------------------------------------------- per tile --
    # 3 chained q-linears (the 4th one is folded into M/sb and N above).
    x = q_ref[...].astype(cdt)
    for w_ref, b_ref in ((w1_ref, b1_ref), (w2_ref, b2_ref), (w3_ref, b3_ref)):
        x = (jnp.dot(x, w_ref[...], preferred_element_type=f32)
             + b_ref[...]).astype(cdt)

    # all-head scores from a single lane-dense MXU matmul: (ts,H)@(H,head*h_w)
    scores = jnp.dot(x, m_scr[...], preferred_element_type=f32) + sb_scr[...]

    # per-head softmax (f32) + K-accumulation of the final projection.
    # (For h_w >= 128 these per-head slices are lane-aligned / full-lane; a
    #  (ts, head, h_w) reshape variant would also lane-pack h_w < 128 cases.)
    acc = jnp.zeros(o_ref.shape, f32)
    for h in range(head):
        c0 = h * h_w
        sc = scores[:, c0:c0 + h_w]                            # (ts, h_w) f32
        m = jnp.max(sc, axis=-1, keepdims=True)
        e = jnp.exp(sc - m)
        s = jnp.sum(e, axis=-1, keepdims=True)
        p = e * pl.reciprocal(s, approx=approx_recip)          # EUP divide
        acc = acc + jnp.dot(p.astype(cdt), n_scr[c0:c0 + h_w, :],
                            preferred_element_type=f32)        # (ts, H)

    # single lane-dense output store (bias of the re-applied 4th linear)
    o_ref[...] = (acc + b4_ref[...]).astype(o_ref.dtype)


def _pick_row_tile(s):
    """Largest 'nice' query-row tile that divides S (multiple of 8 sublanes).

    Capped at 256: ~85% of HBM roofline and v7x-(64 MiB VMEM)-safe.
    """
    for ts in (256, 128, 64, 32, 16, 8):
        if s % ts == 0:
            return ts
    # TODO(synk): pad S instead of making the whole sequence one tile.
    return s


def _vmem_limit_bytes(ts, H, d_model, h_w, head, q_dtype, compute_dtype):
    """Generous VMEM budget estimate; clamped to a range valid on every chip."""
    cb = jnp.dtype(compute_dtype).itemsize
    qb = jnp.dtype(q_dtype).itemsize
    hw_all = head * h_w
    weights = (5 * H * H + 2 * h_w * h_w) * cb          # w1-3, w4, w4c, wk, wv
    biases = (4 * H + 2 * h_w) * 4                      # f32 biases
    act = 2 * ts * H * qb                               # q tile (double-buffered)
    act += 2 * 2 * d_model * h_w * qb                   # k, v blocks
    act += 2 * ts * H * qb                              # out tile
    scratch = (H * hw_all + hw_all * H) * cb + hw_all * 4
    est = 2 * weights + biases + act + scratch          # worst case: 2x weights
    # >= 32 MiB (>= every default scoped limit), <= 64 MiB (v7x physical).
    return int(min(max(2 * est, 32 * 1024 * 1024), 64 * 1024 * 1024))


# ----------------------------------------------------------------------------
# Parameter prep (done ONCE, outside the per-forward hot path)
# ----------------------------------------------------------------------------
def prepare_params(params, *, head, d_k, compute_dtype=jnp.bfloat16):
    """Pre-transpose torch (out,in) weights, fold 1/sqrt(d_k) into wk/bk,
    cast MXU operands to `compute_dtype`, keep biases in f32."""
    cdt = compute_dtype
    inv_sqrt_dk = 1.0 / math.sqrt(d_k)

    def w_t(W):                       # torch (out,in) -> (in,out), MXU dtype
        return jnp.asarray(W, jnp.float32).T.astype(cdt)

    def b_row(b):                     # (out,) -> (1,out), f32
        return jnp.asarray(b, jnp.float32).reshape(1, -1)

    (W1, B1), (W2, B2), (W3, B3), (W4, B4) = params["q"]
    (Wk, Bk), (Wv, Bv) = params["kv"]
    return {
        "w123": [(w_t(W1), b_row(B1)), (w_t(W2), b_row(B2)), (w_t(W3), b_row(B3))],
        "w4": w_t(W4),                                        # (in, out) for N fold
        "w4c": jnp.asarray(W4, jnp.float32).astype(cdt),      # (out, in) for M fold
        "b4": b_row(B4),
        "wk": (jnp.asarray(Wk, jnp.float32).T * inv_sqrt_dk).astype(cdt),
        "bk": b_row(Bk) * inv_sqrt_dk,
        "wv": w_t(Wv),
        "bv": b_row(Bv),
        "compute_dtype": cdt,
    }


# ----------------------------------------------------------------------------
# Forward wrapper
# ----------------------------------------------------------------------------
def multi_headed_attention_forward(prep, query, key, value, *, head, d_k, h_w,
                                    exact_softmax=False):
    B, S, H = query.shape
    d_model = head * d_k
    assert H == d_model
    assert key.shape == (B, d_model, h_w)
    assert value.shape == (B, d_model, h_w)
    cdt = prep["compute_dtype"]

    ts = _pick_row_tile(S)
    grid = (B, S // ts)

    (w1, b1), (w2, b2), (w3, b3) = prep["w123"]
    args = (query, key, value,
            w1, b1, w2, b2, w3, b3,
            prep["w4"], prep["w4c"], prep["b4"],
            prep["wk"], prep["bk"], prep["wv"], prep["bv"])

    kernel = functools.partial(
        _mha_fwd_kernel, head=head, d_k=d_k, h_w=h_w,
        compute_dtype=cdt, approx_recip=not exact_softmax)

    def build(single_buffer_weights):
        if single_buffer_weights:
            # constant index_map -> fetched once; no point double-buffering.
            def wspec(shape):
                return pl.BlockSpec(shape, lambda b, s: (0, 0),
                                    pipeline_mode=pl.Buffered(1))
        else:
            def wspec(shape):
                return pl.BlockSpec(shape, lambda b, s: (0, 0))

        return pl.pallas_call(
            kernel,
            out_shape=jax.ShapeDtypeStruct((B, S, d_model), query.dtype),
            grid_spec=pltpu.PrefetchScalarGridSpec(
                num_scalar_prefetch=0,
                grid=grid,
                in_specs=[
                    # activations
                    pl.BlockSpec((pl.Squeezed(), ts, H), lambda b, s: (b, s, 0)),
                    pl.BlockSpec((pl.Squeezed(), d_model, h_w),
                                 lambda b, s: (b, 0, 0)),
                    pl.BlockSpec((pl.Squeezed(), d_model, h_w),
                                 lambda b, s: (b, 0, 0)),
                    # q-chain weights/biases (resident)
                    wspec((H, H)), wspec((1, H)),
                    wspec((H, H)), wspec((1, H)),
                    wspec((H, H)), wspec((1, H)),
                    # 4th linear: (in,out) + (out,in) copies + bias
                    wspec((H, H)), wspec((H, H)), wspec((1, H)),
                    # k / v projection weights/biases
                    wspec((h_w, h_w)), wspec((1, h_w)),
                    wspec((h_w, h_w)), wspec((1, h_w)),
                ],
                out_specs=pl.BlockSpec((pl.Squeezed(), ts, d_model),
                                       lambda b, s: (b, s, 0)),
                scratch_shapes=[
                    pltpu.VMEM((H, head * h_w), cdt),          # M   (per batch)
                    pltpu.VMEM((head * h_w, H), cdt),          # N   (per batch)
                    pltpu.VMEM((1, head * h_w), jnp.float32),  # sb  (per batch)
                ],
            ),
            compiler_params=pltpu.CompilerParams(
                # b parallel (megacore), s arbitrary (per-batch VMEM cache).
                dimension_semantics=("parallel", "arbitrary"),
                vmem_limit_bytes=_vmem_limit_bytes(
                    ts, H, d_model, h_w, head, query.dtype, cdt),
            ),
        )

    try:
        return build(True)(*args)
    except Exception:
        # pipeline_mode=pl.Buffered(1) not supported by this jax version:
        # fall back to default (double-buffered) constant weight blocks.
        return build(False)(*args)


# ----------------------------------------------------------------------------
# Pure-JAX reference (mirrors the PyTorch module, eval mode, mask=None)
# ----------------------------------------------------------------------------
def reference_forward(params, query, key, value, *, head, d_k, h_w):
    B, S, H = query.shape
    x = query
    for W, b in params["q"]:            # Sequential of all 4 q-Linears
        x = x @ W.T + b
    q = x.reshape(B, S, head, d_k).transpose(0, 2, 1, 3)
    kW, kb = params["kv"][0]
    vW, vb = params["kv"][1]
    k = (key @ kW.T + kb).reshape(B, head, d_k, h_w)
    v = (value @ vW.T + vb).reshape(B, head, d_k, h_w)
    scores = jnp.einsum("bhsd,bhdw->bhsw", q, k) / math.sqrt(d_k)
    p = jax.nn.softmax(scores, axis=-1)
    o = jnp.einsum("bhsw,bhdw->bhsd", p, v)
    x = o.transpose(0, 2, 1, 3).reshape(B, S, head * d_k)
    W4, b4 = params["q"][3]             # linears_q[-1] applied again
    return x @ W4.T + b4


# ----------------------------------------------------------------------------
if __name__ == "__main__":
    # small shapes: head=2, d_model=hidden=32, d_k=16, h_w=16, B=2, S=8
    # (NOTE: these are toy shapes for correctness only; tile/buffering/MXU
    #  decisions should be benchmarked on production-sized H / h_w / S.)
    head, d_model, h_w = 2, 32, 16
    d_k = d_model // head
    hidden = d_model
    B, S = 2, 8

    rng = jax.random.PRNGKey(0)
    keys = jax.random.split(rng, 16)

    # deterministic parameter init (torch Linear shapes: W (out,in), b (out,))
    params = {
        "q": [
            (0.1 * jax.random.normal(keys[i], (hidden, hidden), jnp.float32),
             0.01 * jax.random.normal(keys[i + 4], (hidden,), jnp.float32))
            for i in range(4)
        ],
        "kv": [
            (0.1 * jax.random.normal(keys[8 + i], (h_w, h_w), jnp.float32),
             0.01 * jax.random.normal(keys[10 + i], (h_w,), jnp.float32))
            for i in range(2)
        ],
    }

    query = jax.random.normal(keys[12], (B, S, hidden), jnp.float32)
    key_in = jax.random.normal(keys[13], (B, d_model, h_w), jnp.float32)
    value_in = jax.random.normal(keys[14], (B, d_model, h_w), jnp.float32)

    ref = reference_forward(params, query, key_in, value_in,
                            head=head, d_k=d_k, h_w=h_w)

    # --- f32 MXU operands + exact softmax divide: tight numerical check ------
    prep_f32 = prepare_params(params, head=head, d_k=d_k,
                              compute_dtype=jnp.float32)
    out_f32 = multi_headed_attention_forward(
        prep_f32, query, key_in, value_in,
        head=head, d_k=d_k, h_w=h_w, exact_softmax=True)
    out_f32 = jax.block_until_ready(out_f32)
    assert out_f32.shape == (B, S, d_model)
    assert jnp.allclose(out_f32, ref, atol=2e-3, rtol=2e-3), float(
        jnp.max(jnp.abs(out_f32 - ref)))

    # --- bf16 MXU operands (v6e/v7x fast path), f32 softmax, approx recip ----
    prep_bf16 = prepare_params(params, head=head, d_k=d_k,
                               compute_dtype=jnp.bfloat16)
    out_bf16 = multi_headed_attention_forward(
        prep_bf16, query, key_in, value_in,
        head=head, d_k=d_k, h_w=h_w, exact_softmax=False)
    out_bf16 = jax.block_until_ready(out_bf16)
    assert out_bf16.shape == (B, S, d_model)
    assert jnp.allclose(out_bf16, ref, atol=3e-2, rtol=3e-2), float(
        jnp.max(jnp.abs(out_bf16 - ref)))

    print("KERNEL_OK")
</pallas_src>

<mosaic_0001>
module attributes {stable_mosaic.version = 11 : i64} {
  func.func @_mha_fwd_kernel(%arg0: i32, %arg1: i32, %arg2: memref<1x8x32xf32, #tpu.memory_space<vmem>>, %arg3: memref<1x32x16xf32, #tpu.memory_space<vmem>>, %arg4: memref<1x32x16xf32, #tpu.memory_space<vmem>>, %arg5: memref<32x32xf32, #tpu.memory_space<vmem>>, %arg6: memref<1x32xf32, #tpu.memory_space<vmem>>, %arg7: memref<32x32xf32, #tpu.memory_space<vmem>>, %arg8: memref<1x32xf32, #tpu.memory_space<vmem>>, %arg9: memref<32x32xf32, #tpu.memory_space<vmem>>, %arg10: memref<1x32xf32, #tpu.memory_space<vmem>>, %arg11: memref<32x32xf32, #tpu.memory_space<vmem>>, %arg12: memref<32x32xf32, #tpu.memory_space<vmem>>, %arg13: memref<1x32xf32, #tpu.memory_space<vmem>>, %arg14: memref<16x16xf32, #tpu.memory_space<vmem>>, %arg15: memref<1x16xf32, #tpu.memory_space<vmem>>, %arg16: memref<16x16xf32, #tpu.memory_space<vmem>>, %arg17: memref<1x16xf32, #tpu.memory_space<vmem>>, %arg18: memref<1x8x32xf32, #tpu.memory_space<vmem>>, %arg19: memref<32x32xf32, #tpu.memory_space<vmem>>, %arg20: memref<32x32xf32, #tpu.memory_space<vmem>>, %arg21: memref<1x32xf32, #tpu.memory_space<vmem>>) attributes {dimension_semantics = [#tpu.dimension_semantics<parallel>, #tpu.dimension_semantics<arbitrary>], iteration_bounds = array<i64: 2, 1>, scalar_prefetch = 0 : i64, scratch_operands = 3 : i64, tpu.core_type = #tpu.core_type<tc>, window_params = [{transform_indices = @transform_0, window_bounds = array<i64: 1, 8, 32>}, {transform_indices = @transform_1, window_bounds = array<i64: 1, 32, 16>}, {transform_indices = @transform_2, window_bounds = array<i64: 1, 32, 16>}, {pipeline_mode = #tpu.pipeline_mode<synchronous>, transform_indices = @transform_3, window_bounds = array<i64: 32, 32>}, {pipeline_mode = #tpu.pipeline_mode<synchronous>, transform_indices = @transform_4, window_bounds = array<i64: 1, 32>}, {pipeline_mode = #tpu.pipeline_mode<synchronous>, transform_indices = @transform_5, window_bounds = array<i64: 32, 32>}, {pipeline_mode = #tpu.pipeline_mode<synchronous>, transform_indices = @transform_6, window_bounds = array<i64: 1, 32>}, {pipeline_mode = #tpu.pipeline_mode<synchronous>, transform_indices = @transform_7, window_bounds = array<i64: 32, 32>}, {pipeline_mode = #tpu.pipeline_mode<synchronous>, transform_indices = @transform_8, window_bounds = array<i64: 1, 32>}, {pipeline_mode = #tpu.pipeline_mode<synchronous>, transform_indices = @transform_9, window_bounds = array<i64: 32, 32>}, {pipeline_mode = #tpu.pipeline_mode<synchronous>, transform_indices = @transform_10, window_bounds = array<i64: 32, 32>}, {pipeline_mode = #tpu.pipeline_mode<synchronous>, transform_indices = @transform_11, window_bounds = array<i64: 1, 32>}, {pipeline_mode = #tpu.pipeline_mode<synchronous>, transform_indices = @transform_12, window_bounds = array<i64: 16, 16>}, {pipeline_mode = #tpu.pipeline_mode<synchronous>, transform_indices = @transform_13, window_bounds = array<i64: 1, 16>}, {pipeline_mode = #tpu.pipeline_mode<synchronous>, transform_indices = @transform_14, window_bounds = array<i64: 16, 16>}, {pipeline_mode = #tpu.pipeline_mode<synchronous>, transform_indices = @transform_15, window_bounds = array<i64: 1, 16>}, {transform_indices = @transform_16, window_bounds = array<i64: 1, 8, 32>}]} {
    %c0_i32 = arith.constant 0 : i32
    %0 = arith.cmpi eq, %arg1, %c0_i32 : i32
    %1 = arith.extui %0 : i1 to i32
    %c0_i32_0 = arith.constant 0 : i32
    %2 = arith.cmpi ne, %1, %c0_i32_0 : i32
    scf.if %2 {
      %c0_37 = arith.constant 0 : index
      %c0_38 = arith.constant 0 : index
      %60 = vector.load %arg13[%c0_37, %c0_38] : memref<1x32xf32, #tpu.memory_space<vmem>>, vector<1x32xf32>
      %c0_39 = arith.constant 0 : index
      %c0_40 = arith.constant 0 : index
      %c0_41 = arith.constant 0 : index
      %61 = vector.load %arg3[%c0_39, %c0_40, %c0_41] : memref<1x32x16xf32, #tpu.memory_space<vmem>>, vector<1x16x16xf32>
      %62 = vector.shape_cast %61 : vector<1x16x16xf32> to vector<16x16xf32>
      %c0_42 = arith.constant 0 : index
      %c0_43 = arith.constant 0 : index
      %63 = vector.load %arg14[%c0_42, %c0_43] : memref<16x16xf32, #tpu.memory_space<vmem>>, vector<16x16xf32>
      %cst_44 = arith.constant dense<0.000000e+00> : vector<16x16xf32>
      %64 = tpu.matmul %62, %63, %cst_44 {dimension_numbers = #tpu.dot_dimension_numbers<[1], [0], [0], [1], [0, 0, 1, 1], [], []>} : vector<16x16xf32>, vector<16x16xf32>, vector<16x16xf32> -> vector<16x16xf32>
      %c0_45 = arith.constant 0 : index
      %c0_46 = arith.constant 0 : index
      %65 = vector.load %arg15[%c0_45, %c0_46] : memref<1x16xf32, #tpu.memory_space<vmem>>, vector<1x16xf32>
      %66 = vector.broadcast %65 : vector<1x16xf32> to vector<16x16xf32>
      %67 = arith.addf %64, %66 : vector<16x16xf32>
      %c0_47 = arith.constant 0 : index
      %c0_48 = arith.constant 0 : index
      %c0_49 = arith.constant 0 : index
      %68 = vector.load %arg4[%c0_47, %c0_48, %c0_49] : memref<1x32x16xf32, #tpu.memory_space<vmem>>, vector<1x16x16xf32>
      %69 = vector.shape_cast %68 : vector<1x16x16xf32> to vector<16x16xf32>
      %c0_50 = arith.constant 0 : index
      %c0_51 = arith.constant 0 : index
      %70 = vector.load %arg16[%c0_50, %c0_51] : memref<16x16xf32, #tpu.memory_space<vmem>>, vector<16x16xf32>
      %cst_52 = arith.constant dense<0.000000e+00> : vector<16x16xf32>
      %71 = tpu.matmul %69, %70, %cst_52 {dimension_numbers = #tpu.dot_dimension_numbers<[1], [0], [0], [1], [0, 0, 1, 1], [], []>} : vector<16x16xf32>, vector<16x16xf32>, vector<16x16xf32> -> vector<16x16xf32>
      %c0_53 = arith.constant 0 : index
      %c0_54 = arith.constant 0 : index
      %72 = vector.load %arg17[%c0_53, %c0_54] : memref<1x16xf32, #tpu.memory_space<vmem>>, vector<1x16xf32>
      %73 = vector.broadcast %72 : vector<1x16xf32> to vector<16x16xf32>
      %74 = arith.addf %71, %73 : vector<16x16xf32>
      %c0_55 = arith.constant 0 : index
      %c0_56 = arith.constant 0 : index
      %75 = vector.load %arg12[%c0_55, %c0_56] : memref<32x32xf32, #tpu.memory_space<vmem>>, vector<16x32xf32>
      %cst_57 = arith.constant dense<0.000000e+00> : vector<32x16xf32>
      %76 = tpu.matmul %75, %67, %cst_57 {dimension_numbers = #tpu.dot_dimension_numbers<[0], [0], [1], [1], [0, 1, 1, 1], [], []>} : vector<16x32xf32>, vector<16x16xf32>, vector<32x16xf32> -> vector<32x16xf32>
      %77 = vector.extract_strided_slice %60 {offsets = [0, 0], sizes = [1, 16], strides = [1, 1]} : vector<1x32xf32> to vector<1x16xf32>
      %cst_58 = arith.constant dense<0.000000e+00> : vector<1x16xf32>
      %78 = tpu.matmul %77, %67, %cst_58 {dimension_numbers = #tpu.dot_dimension_numbers<[1], [0], [0], [1], [0, 0, 1, 1], [], []>} : vector<1x16xf32>, vector<16x16xf32>, vector<1x16xf32> -> vector<1x16xf32>
      %c0_59 = arith.constant 0 : index
      %c0_60 = arith.constant 0 : index
      %79 = vector.load %arg11[%c0_59, %c0_60] : memref<32x32xf32, #tpu.memory_space<vmem>>, vector<16x32xf32>
      %cst_61 = arith.constant dense<0.000000e+00> : vector<16x32xf32>
      %80 = tpu.matmul %74, %79, %cst_61 {dimension_numbers = #tpu.dot_dimension_numbers<[0], [0], [1], [1], [0, 1, 1, 1], [], []>} : vector<16x16xf32>, vector<16x32xf32>, vector<16x32xf32> -> vector<16x32xf32>
      %c0_62 = arith.constant 0 : index
      %c0_63 = arith.constant 0 : index
      %81 = vector.load %arg19[%c0_62, %c0_63] : memref<32x32xf32, #tpu.memory_space<vmem>>, vector<32x16xf32>
      tpu.vector_store %arg19[%c0_62, %c0_63], %76 {strides = array<i32>} : memref<32x32xf32, #tpu.memory_space<vmem>>, vector<32x16xf32>,
      %c0_64 = arith.constant 0 : index
      %c0_65 = arith.constant 0 : index
      %82 = vector.load %arg21[%c0_64, %c0_65] : memref<1x32xf32, #tpu.memory_space<vmem>>, vector<1x16xf32>
      tpu.vector_store %arg21[%c0_64, %c0_65], %78 {strides = array<i32>} : memref<1x32xf32, #tpu.memory_space<vmem>>, vector<1x16xf32>,
      %c0_66 = arith.constant 0 : index
      %c0_67 = arith.constant 0 : index
      %83 = vector.load %arg20[%c0_66, %c0_67] : memref<32x32xf32, #tpu.memory_space<vmem>>, vector<16x32xf32>
      tpu.vector_store %arg20[%c0_66, %c0_67], %80 {strides = array<i32>} : memref<32x32xf32, #tpu.memory_space<vmem>>, vector<16x32xf32>,
      %c0_68 = arith.constant 0 : index
      %c16_69 = arith.constant 16 : index
      %c0_70 = arith.constant 0 : index
      %84 = vector.load %arg3[%c0_68, %c16_69, %c0_70] : memref<1x32x16xf32, #tpu.memory_space<vmem>>, vector<1x16x16xf32>
      %85 = vector.shape_cast %84 : vector<1x16x16xf32> to vector<16x16xf32>
      %c0_71 = arith.constant 0 : index
      %c0_72 = arith.constant 0 : index
      %86 = vector.load %arg14[%c0_71, %c0_72] : memref<16x16xf32, #tpu.memory_space<vmem>>, vector<16x16xf32>
      %cst_73 = arith.constant dense<0.000000e+00> : vector<16x16xf32>
      %87 = tpu.matmul %85, %86, %cst_73 {dimension_numbers = #tpu.dot_dimension_numbers<[1], [0], [0], [1], [0, 0, 1, 1], [], []>} : vector<16x16xf32>, vector<16x16xf32>, vector<16x16xf32> -> vector<16x16xf32>
      %c0_74 = arith.constant 0 : index
      %c0_75 = arith.constant 0 : index
      %88 = vector.load %arg15[%c0_74, %c0_75] : memref<1x16xf32, #tpu.memory_space<vmem>>, vector<1x16xf32>
      %89 = vector.broadcast %88 : vector<1x16xf32> to vector<16x16xf32>
      %90 = arith.addf %87, %89 : vector<16x16xf32>
      %c0_76 = arith.constant 0 : index
      %c16_77 = arith.constant 16 : index
      %c0_78 = arith.constant 0 : index
      %91 = vector.load %arg4[%c0_76, %c16_77, %c0_78] : memref<1x32x16xf32, #tpu.memory_space<vmem>>, vector<1x16x16xf32>
      %92 = vector.shape_cast %91 : vector<1x16x16xf32> to vector<16x16xf32>
      %c0_79 = arith.constant 0 : index
      %c0_80 = arith.constant 0 : index
      %93 = vector.load %arg16[%c0_79, %c0_80] : memref<16x16xf32, #tpu.memory_space<vmem>>, vector<16x16xf32>
      %cst_81 = arith.constant dense<0.000000e+00> : vector<16x16xf32>
      %94 = tpu.matmul %92, %93, %cst_81 {dimension_numbers = #tpu.dot_dimension_numbers<[1], [0], [0], [1], [0, 0, 1, 1], [], []>} : vector<16x16xf32>, vector<16x16xf32>, vector<16x16xf32> -> vector<16x16xf32>
      %c0_82 = arith.constant 0 : index
      %c0_83 = arith.constant 0 : index
      %95 = vector.load %arg17[%c0_82, %c0_83] : memref<1x16xf32, #tpu.memory_space<vmem>>, vector<1x16xf32>
      %96 = vector.broadcast %95 : vector<1x16xf32> to vector<16x16xf32>
      %97 = arith.addf %94, %96 : vector<16x16xf32>
      %c16_84 = arith.constant 16 : index
      %c0_85 = arith.constant 0 : index
      %98 = vector.load %arg12[%c16_84, %c0_85] : memref<32x32xf32, #tpu.memory_space<vmem>>, vector<16x32xf32>
      %cst_86 = arith.constant dense<0.000000e+00> : vector<32x16xf32>
      %99 = tpu.matmul %98, %90, %cst_86 {dimension_numbers = #tpu.dot_dimension_numbers<[0], [0], [1], [1], [0, 1, 1, 1], [], []>} : vector<16x32xf32>, vector<16x16xf32>, vector<32x16xf32> -> vector<32x16xf32>
      %100 = vector.extract_strided_slice %60 {offsets = [0, 16], sizes = [1, 16], strides = [1, 1]} : vector<1x32xf32> to vector<1x16xf32>
      %cst_87 = arith.constant dense<0.000000e+00> : vector<1x16xf32>
      %101 = tpu.matmul %100, %90, %cst_87 {dimension_numbers = #tpu.dot_dimension_numbers<[1], [0], [0], [1], [0, 0, 1, 1], [], []>} : vector<1x16xf32>, vector<16x16xf32>, vector<1x16xf32> -> vector<1x16xf32>
      %c16_88 = arith.constant 16 : index
      %c0_89 = arith.constant 0 : index
      %102 = vector.load %arg11[%c16_88, %c0_89] : memref<32x32xf32, #tpu.memory_space<vmem>>, vector<16x32xf32>
      %cst_90 = arith.constant dense<0.000000e+00> : vector<16x32xf32>
      %103 = tpu.matmul %97, %102, %cst_90 {dimension_numbers = #tpu.dot_dimension_numbers<[0], [0], [1], [1], [0, 1, 1, 1], [], []>} : vector<16x16xf32>, vector<16x32xf32>, vector<16x32xf32> -> vector<16x32xf32>
      %c0_91 = arith.constant 0 : index
      %c16_92 = arith.constant 16 : index
      %104 = vector.load %arg19[%c0_91, %c16_92] : memref<32x32xf32, #tpu.memory_space<vmem>>, vector<32x16xf32>
      tpu.vector_store %arg19[%c0_91, %c16_92], %99 {strides = array<i32>} : memref<32x32xf32, #tpu.memory_space<vmem>>, vector<32x16xf32>,
      %c0_93 = arith.constant 0 : index
      %c16_94 = arith.constant 16 : index
      %105 = vector.load %arg21[%c0_93, %c16_94] : memref<1x32xf32, #tpu.memory_space<vmem>>, vector<1x16xf32>
      tpu.vector_store %arg21[%c0_93, %c16_94], %101 {strides = array<i32>} : memref<1x32xf32, #tpu.memory_space<vmem>>, vector<1x16xf32>,
      %c16_95 = arith.constant 16 : index
      %c0_96 = arith.constant 0 : index
      %106 = vector.load %arg20[%c16_95, %c0_96] : memref<32x32xf32, #tpu.memory_space<vmem>>, vector<16x32xf32>
      tpu.vector_store %arg20[%c16_95, %c0_96], %103 {strides = array<i32>} : memref<32x32xf32, #tpu.memory_space<vmem>>, vector<16x32xf32>,
    } else {
    }
    %c0 = arith.constant 0 : index
    %c0_1 = arith.constant 0 : index
    %c0_2 = arith.constant 0 : index
    %3 = vector.load %arg2[%c0, %c0_1, %c0_2] : memref<1x8x32xf32, #tpu.memory_space<vmem>>, vector<1x8x32xf32>
    %4 = vector.shape_cast %3 : vector<1x8x32xf32> to vector<8x32xf32>
    %c0_3 = arith.constant 0 : index
    %c0_4 = arith.constant 0 : index
    %5 = vector.load %arg5[%c0_3, %c0_4] : memref<32x32xf32, #tpu.memory_space<vmem>>, vector<32x32xf32>
    %cst = arith.constant dense<0.000000e+00> : vector<8x32xf32>
    %6 = tpu.matmul %4, %5, %cst {dimension_numbers = #tpu.dot_dimension_numbers<[1], [0], [0], [1], [0, 0, 1, 1], [], []>} : vector<8x32xf32>, vector<32x32xf32>, vector<8x32xf32> -> vector<8x32xf32>
    %c0_5 = arith.constant 0 : index
    %c0_6 = arith.constant 0 : index
    %7 = vector.load %arg6[%c0_5, %c0_6] : memref<1x32xf32, #tpu.memory_space<vmem>>, vector<1x32xf32>
    %8 = vector.broadcast %7 : vector<1x32xf32> to vector<8x32xf32>
    %9 = arith.addf %6, %8 : vector<8x32xf32>
    %c0_7 = arith.constant 0 : index
    %c0_8 = arith.constant 0 : index
    %10 = vector.load %arg7[%c0_7, %c0_8] : memref<32x32xf32, #tpu.memory_space<vmem>>, vector<32x32xf32>
    %cst_9 = arith.constant dense<0.000000e+00> : vector<8x32xf32>
    %11 = tpu.matmul %9, %10, %cst_9 {dimension_numbers = #tpu.dot_dimension_numbers<[1], [0], [0], [1], [0, 0, 1, 1], [], []>} : vector<8x32xf32>, vector<32x32xf32>, vector<8x32xf32> -> vector<8x32xf32>
    %c0_10 = arith.constant 0 : index
    %c0_11 = arith.constant 0 : index
    %12 = vector.load %arg8[%c0_10, %c0_11] : memref<1x32xf32, #tpu.memory_space<vmem>>, vector<1x32xf32>
    %13 = vector.broadcast %12 : vector<1x32xf32> to vector<8x32xf32>
    %14 = arith.addf %11, %13 : vector<8x32xf32>
    %c0_12 = arith.constant 0 : index
    %c0_13 = arith.constant 0 : index
    %15 = vector.load %arg9[%c0_12, %c0_13] : memref<32x32xf32, #tpu.memory_space<vmem>>, vector<32x32xf32>
    %cst_14 = arith.constant dense<0.000000e+00> : vector<8x32xf32>
    %16 = tpu.matmul %14, %15, %cst_14 {dimension_numbers = #tpu.dot_dimension_numbers<[1], [0], [0], [1], [0, 0, 1, 1], [], []>} : vector<8x32xf32>, vector<32x32xf32>, vector<8x32xf32> -> vector<8x32xf32>
    %c0_15 = arith.constant 0 : index
    %c0_16 = arith.constant 0 : index
    %17 = vector.load %arg10[%c0_15, %c0_16] : memref<1x32xf32, #tpu.memory_space<vmem>>, vector<1x32xf32>
    %18 = vector.broadcast %17 : vector<1x32xf32> to vector<8x32xf32>
    %19 = arith.addf %16, %18 : vector<8x32xf32>
    %c0_17 = arith.constant 0 : index
    %c0_18 = arith.constant 0 : index
    %20 = vector.load %arg19[%c0_17, %c0_18] : memref<32x32xf32, #tpu.memory_space<vmem>>, vector<32x32xf32>
    %cst_19 = arith.constant dense<0.000000e+00> : vector<8x32xf32>
    %21 = tpu.matmul %19, %20, %cst_19 {dimension_numbers = #tpu.dot_dimension_numbers<[1], [0], [0], [1], [0, 0, 1, 1], [], []>} : vector<8x32xf32>, vector<32x32xf32>, vector<8x32xf32> -> vector<8x32xf32>
    %c0_20 = arith.constant 0 : index
    %c0_21 = arith.constant 0 : index
    %22 = vector.load %arg21[%c0_20, %c0_21] : memref<1x32xf32, #tpu.memory_space<vmem>>, vector<1x32xf32>
    %23 = vector.broadcast %22 : vector<1x32xf32> to vector<8x32xf32>
    %24 = arith.addf %21, %23 : vector<8x32xf32>
    %cst_22 = arith.constant 0.000000e+00 : f32
    %25 = vector.broadcast %cst_22 : f32 to vector<8x32xf32>
    %26 = vector.extract_strided_slice %24 {offsets = [0, 0], sizes = [8, 16], strides = [1, 1]} : vector<8x32xf32> to vector<8x16xf32>
    %cst_23 = arith.constant dense<0xFF800000> : vector<8xf32>
    %27 = vector.multi_reduction <maximumf>, %26, %cst_23 [1] : vector<8x16xf32> to vector<8xf32>
    %28 = vector.shape_cast %27 : vector<8xf32> to vector<8x1xf32>
    %29 = vector.broadcast %28 : vector<8x1xf32> to vector<8x16xf32>
    %30 = arith.subf %26, %29 : vector<8x16xf32>
    %31 = math.exp %30 : vector<8x16xf32>
    %cst_24 = arith.constant dense<0.000000e+00> : vector<8xf32>
    %32 = vector.multi_reduction <add>, %31, %cst_24 [1] : vector<8x16xf32> to vector<8xf32>
    %33 = vector.shape_cast %32 : vector<8xf32> to vector<8x1xf32>
    %34 = tpu.reciprocal %33 : vector<8x1xf32> -> vector<8x1xf32>
    %35 = vector.broadcast %34 : vector<8x1xf32> to vector<8x16xf32>
    %36 = arith.mulf %31, %35 : vector<8x16xf32>
    %c0_25 = arith.constant 0 : index
    %c0_26 = arith.constant 0 : index
    %37 = vector.load %arg20[%c0_25, %c0_26] : memref<32x32xf32, #tpu.memory_space<vmem>>, vector<16x32xf32>
    %cst_27 = arith.constant dense<0.000000e+00> : vector<8x32xf32>
    %38 = tpu.matmul %36, %37, %cst_27 {dimension_numbers = #tpu.dot_dimension_numbers<[1], [0], [0], [1], [0, 0, 1, 1], [], []>} : vector<8x16xf32>, vector<16x32xf32>, vector<8x32xf32> -> vector<8x32xf32>
    %39 = arith.addf %25, %38 : vector<8x32xf32>
    %40 = vector.extract_strided_slice %24 {offsets = [0, 16], sizes = [8, 16], strides = [1, 1]} : vector<8x32xf32> to vector<8x16xf32>
    %cst_28 = arith.constant dense<0xFF800000> : vector<8xf32>
    %41 = vector.multi_reduction <maximumf>, %40, %cst_28 [1] : vector<8x16xf32> to vector<8xf32>
    %42 = vector.shape_cast %41 : vector<8xf32> to vector<8x1xf32>
    %43 = vector.broadcast %42 : vector<8x1xf32> to vector<8x16xf32>
    %44 = arith.subf %40, %43 : vector<8x16xf32>
    %45 = math.exp %44 : vector<8x16xf32>
    %cst_29 = arith.constant dense<0.000000e+00> : vector<8xf32>
    %46 = vector.multi_reduction <add>, %45, %cst_29 [1] : vector<8x16xf32> to vector<8xf32>
    %47 = vector.shape_cast %46 : vector<8xf32> to vector<8x1xf32>
    %48 = tpu.reciprocal %47 : vector<8x1xf32> -> vector<8x1xf32>
    %49 = vector.broadcast %48 : vector<8x1xf32> to vector<8x16xf32>
    %50 = arith.mulf %45, %49 : vector<8x16xf32>
    %c16 = arith.constant 16 : index
    %c0_30 = arith.constant 0 : index
    %51 = vector.load %arg20[%c16, %c0_30] : memref<32x32xf32, #tpu.memory_space<vmem>>, vector<16x32xf32>
    %cst_31 = arith.constant dense<0.000000e+00> : vector<8x32xf32>
    %52 = tpu.matmul %50, %51, %cst_31 {dimension_numbers = #tpu.dot_dimension_numbers<[1], [0], [0], [1], [0, 0, 1, 1], [], []>} : vector<8x16xf32>, vector<16x32xf32>, vector<8x32xf32> -> vector<8x32xf32>
    %53 = arith.addf %39, %52 : vector<8x32xf32>
    %c0_32 = arith.constant 0 : index
    %c0_33 = arith.constant 0 : index
    %54 = vector.load %arg13[%c0_32, %c0_33] : memref<1x32xf32, #tpu.memory_space<vmem>>, vector<1x32xf32>
    %55 = vector.broadcast %54 : vector<1x32xf32> to vector<8x32xf32>
    %56 = arith.addf %53, %55 : vector<8x32xf32>
    %c0_34 = arith.constant 0 : index
    %c0_35 = arith.constant 0 : index
    %c0_36 = arith.constant 0 : index
    %57 = vector.load %arg18[%c0_34, %c0_35, %c0_36] : memref<1x8x32xf32, #tpu.memory_space<vmem>>, vector<1x8x32xf32>
    %58 = vector.shape_cast %57 : vector<1x8x32xf32> to vector<8x32xf32>
    %59 = vector.shape_cast %56 : vector<8x32xf32> to vector<1x8x32xf32>
    tpu.vector_store %arg18[%c0_34, %c0_35, %c0_36], %59 {strides = array<i32>} : memref<1x8x32xf32, #tpu.memory_space<vmem>>, vector<1x8x32xf32>,
    return
  }
  func.func @transform_0(%arg0: i32, %arg1: i32) -> (i32, i32, i32) {
    %c0_i32 = arith.constant 0 : i32
    %c0_i32_0 = arith.constant 0 : i32
    return %arg0, %arg1, %c0_i32 : i32, i32, i32
  }
  func.func @transform_1(%arg0: i32, %arg1: i32) -> (i32, i32, i32) {
    %c0_i32 = arith.constant 0 : i32
    %c0_i32_0 = arith.constant 0 : i32
    %c0_i32_1 = arith.constant 0 : i32
    return %arg0, %c0_i32, %c0_i32_0 : i32, i32, i32
  }
  func.func @transform_2(%arg0: i32, %arg1: i32) -> (i32, i32, i32) {
    %c0_i32 = arith.constant 0 : i32
    %c0_i32_0 = arith.constant 0 : i32
    %c0_i32_1 = arith.constant 0 : i32
    return %arg0, %c0_i32, %c0_i32_0 : i32, i32, i32
  }
  func.func @transform_3(%arg0: i32, %arg1: i32) -> (i32, i32) {
    %c0_i32 = arith.constant 0 : i32
    %c0_i32_0 = arith.constant 0 : i32
    %c0_i32_1 = arith.constant 0 : i32
    return %c0_i32, %c0_i32_0 : i32, i32
  }
  func.func @transform_4(%arg0: i32, %arg1: i32) -> (i32, i32) {
    %c0_i32 = arith.constant 0 : i32
    %c0_i32_0 = arith.constant 0 : i32
    %c0_i32_1 = arith.constant 0 : i32
    return %c0_i32, %c0_i32_0 : i32, i32
  }
  func.func @transform_5(%arg0: i32, %arg1: i32) -> (i32, i32) {
    %c0_i32 = arith.constant 0 : i32
    %c0_i32_0 = arith.constant 0 : i32
    %c0_i32_1 = arith.constant 0 : i32
    return %c0_i32, %c0_i32_0 : i32, i32
  }
  func.func @transform_6(%arg0: i32, %arg1: i32) -> (i32, i32) {
    %c0_i32 = arith.constant 0 : i32
    %c0_i32_0 = arith.constant 0 : i32
    %c0_i32_1 = arith.constant 0 : i32
    return %c0_i32, %c0_i32_0 : i32, i32
  }
  func.func @transform_7(%arg0: i32, %arg1: i32) -> (i32, i32) {
    %c0_i32 = arith.constant 0 : i32
    %c0_i32_0 = arith.constant 0 : i32
    %c0_i32_1 = arith.constant 0 : i32
    return %c0_i32, %c0_i32_0 : i32, i32
  }
  func.func @transform_8(%arg0: i32, %arg1: i32) -> (i32, i32) {
    %c0_i32 = arith.constant 0 : i32
    %c0_i32_0 = arith.constant 0 : i32
    %c0_i32_1 = arith.constant 0 : i32
    return %c0_i32, %c0_i32_0 : i32, i32
  }
  func.func @transform_9(%arg0: i32, %arg1: i32) -> (i32, i32) {
    %c0_i32 = arith.constant 0 : i32
    %c0_i32_0 = arith.constant 0 : i32
    %c0_i32_1 = arith.constant 0 : i32
    return %c0_i32, %c0_i32_0 : i32, i32
  }
  func.func @transform_10(%arg0: i32, %arg1: i32) -> (i32, i32) {
    %c0_i32 = arith.constant 0 : i32
    %c0_i32_0 = arith.constant 0 : i32
    %c0_i32_1 = arith.constant 0 : i32
    return %c0_i32, %c0_i32_0 : i32, i32
  }
  func.func @transform_11(%arg0: i32, %arg1: i32) -> (i32, i32) {
    %c0_i32 = arith.constant 0 : i32
    %c0_i32_0 = arith.constant 0 : i32
    %c0_i32_1 = arith.constant 0 : i32
    return %c0_i32, %c0_i32_0 : i32, i32
  }
  func.func @transform_12(%arg0: i32, %arg1: i32) -> (i32, i32) {
    %c0_i32 = arith.constant 0 : i32
    %c0_i32_0 = arith.constant 0 : i32
    %c0_i32_1 = arith.constant 0 : i32
    return %c0_i32, %c0_i32_0 : i32, i32
  }
  func.func @transform_13(%arg0: i32, %arg1: i32) -> (i32, i32) {
    %c0_i32 = arith.constant 0 : i32
    %c0_i32_0 = arith.constant 0 : i32
    %c0_i32_1 = arith.constant 0 : i32
    return %c0_i32, %c0_i32_0 : i32, i32
  }
  func.func @transform_14(%arg0: i32, %arg1: i32) -> (i32, i32) {
    %c0_i32 = arith.constant 0 : i32
    %c0_i32_0 = arith.constant 0 : i32
    %c0_i32_1 = arith.constant 0 : i32
    return %c0_i32, %c0_i32_0 : i32, i32
  }
  func.func @transform_15(%arg0: i32, %arg1: i32) -> (i32, i32) {
    %c0_i32 = arith.constant 0 : i32
    %c0_i32_0 = arith.constant 0 : i32
    %c0_i32_1 = arith.constant 0 : i32
    return %c0_i32, %c0_i32_0 : i32, i32
  }
  func.func @transform_16(%arg0: i32, %arg1: i32) -> (i32, i32, i32) {
    %c0_i32 = arith.constant 0 : i32
    %c0_i32_0 = arith.constant 0 : i32
    return %arg0, %arg1, %c0_i32 : i32, i32, i32
  }
}

module attributes {stable_mosaic.version = 11 : i64} {
  func.func @_mha_fwd_kernel(%arg0: i32, %arg1: i32, %arg2: memref<1x8x32xf32, #tpu.memory_space<vmem>>, %arg3: memref<1x32x16xf32, #tpu.memory_space<vmem>>, %arg4: memref<1x32x16xf32, #tpu.memory_space<vmem>>, %arg5: memref<32x32xf32, #tpu.memory_space<vmem>>, %arg6: memref<1x32xf32, #tpu.memory_space<vmem>>, %arg7: memref<32x32xf32, #tpu.memory_space<vmem>>, %arg8: memref<1x32xf32, #tpu.memory_space<vmem>>, %arg9: memref<32x32xf32, #tpu.memory_space<vmem>>, %arg10: memref<1x32xf32, #tpu.memory_space<vmem>>, %arg11: memref<32x32xf32, #tpu.memory_space<vmem>>, %arg12: memref<32x32xf32, #tpu.memory_space<vmem>>, %arg13: memref<1x32xf32, #tpu.memory_space<vmem>>, %arg14: memref<16x16xf32, #tpu.memory_space<vmem>>, %arg15: memref<1x16xf32, #tpu.memory_space<vmem>>, %arg16: memref<16x16xf32, #tpu.memory_space<vmem>>, %arg17: memref<1x16xf32, #tpu.memory_space<vmem>>, %arg18: memref<1x8x32xf32, #tpu.memory_space<vmem>>, %arg19: memref<32x32xf32, #tpu.memory_space<vmem>>, %arg20: memref<32x32xf32, #tpu.memory_space<vmem>>, %arg21: memref<1x32xf32, #tpu.memory_space<vmem>>) attributes {dimension_semantics = [#tpu.dimension_semantics<parallel>, #tpu.dimension_semantics<arbitrary>], iteration_bounds = array<i64: 2, 1>, scalar_prefetch = 0 : i64, scratch_operands = 3 : i64, tpu.core_type = #tpu.core_type<tc>, window_params = [{transform_indices = @transform_0, window_bounds = array<i64: 1, 8, 32>}, {transform_indices = @transform_1, window_bounds = array<i64: 1, 32, 16>}, {transform_indices = @transform_2, window_bounds = array<i64: 1, 32, 16>}, {pipeline_mode = #tpu.pipeline_mode<synchronous>, transform_indices = @transform_3, window_bounds = array<i64: 32, 32>}, {pipeline_mode = #tpu.pipeline_mode<synchronous>, transform_indices = @transform_4, window_bounds = array<i64: 1, 32>}, {pipeline_mode = #tpu.pipeline_mode<synchronous>, transform_indices = @transform_5, window_bounds = array<i64: 32, 32>}, {pipeline_mode = #tpu.pipeline_mode<synchronous>, transform_indices = @transform_6, window_bounds = array<i64: 1, 32>}, {pipeline_mode = #tpu.pipeline_mode<synchronous>, transform_indices = @transform_7, window_bounds = array<i64: 32, 32>}, {pipeline_mode = #tpu.pipeline_mode<synchronous>, transform_indices = @transform_8, window_bounds = array<i64: 1, 32>}, {pipeline_mode = #tpu.pipeline_mode<synchronous>, transform_indices = @transform_9, window_bounds = array<i64: 32, 32>}, {pipeline_mode = #tpu.pipeline_mode<synchronous>, transform_indices = @transform_10, window_bounds = array<i64: 32, 32>}, {pipeline_mode = #tpu.pipeline_mode<synchronous>, transform_indices = @transform_11, window_bounds = array<i64: 1, 32>}, {pipeline_mode = #tpu.pipeline_mode<synchronous>, transform_indices = @transform_12, window_bounds = array<i64: 16, 16>}, {pipeline_mode = #tpu.pipeline_mode<synchronous>, transform_indices = @transform_13, window_bounds = array<i64: 1, 16>}, {pipeline_mode = #tpu.pipeline_mode<synchronous>, transform_indices = @transform_14, window_bounds = array<i64: 16, 16>}, {pipeline_mode = #tpu.pipeline_mode<synchronous>, transform_indices = @transform_15, window_bounds = array<i64: 1, 16>}, {transform_indices = @transform_16, window_bounds = array<i64: 1, 8, 32>}]} {
    %c0_i32 = arith.constant 0 : i32
    %0 = arith.cmpi eq, %arg1, %c0_i32 : i32
    %1 = arith.extui %0 : i1 to i32
    %c0_i32_0 = arith.constant 0 : i32
    %2 = arith.cmpi ne, %1, %c0_i32_0 : i32
    scf.if %2 {
      %c0_37 = arith.constant 0 : index
      %c0_38 = arith.constant 0 : index
      %60 = vector.load %arg13[%c0_37, %c0_38] : memref<1x32xf32, #tpu.memory_space<vmem>>, vector<1x32xf32>
      %c0_39 = arith.constant 0 : index
      %c0_40 = arith.constant 0 : index
      %c0_41 = arith.constant 0 : index
      %61 = vector.load %arg3[%c0_39, %c0_40, %c0_41] : memref<1x32x16xf32, #tpu.memory_space<vmem>>, vector<1x16x16xf32>
      %62 = vector.shape_cast %61 : vector<1x16x16xf32> to vector<16x16xf32>
      %c0_42 = arith.constant 0 : index
      %c0_43 = arith.constant 0 : index
      %63 = vector.load %arg14[%c0_42, %c0_43] : memref<16x16xf32, #tpu.memory_space<vmem>>, vector<16x16xf32>
      %cst_44 = arith.constant dense<0.000000e+00> : vector<16x16xf32>
      %64 = tpu.matmul %62, %63, %cst_44 {dimension_numbers = #tpu.dot_dimension_numbers<[1], [0], [0], [1], [0, 0, 1, 1], [], []>} : vector<16x16xf32>, vector<16x16xf32>, vector<16x16xf32> -> vector<16x16xf32>
      %c0_45 = arith.constant 0 : index
      %c0_46 = arith.constant 0 : index
      %65 = vector.load %arg15[%c0_45, %c0_46] : memref<1x16xf32, #tpu.memory_space<vmem>>, vector<1x16xf32>
      %66 = vector.broadcast %65 : vector<1x16xf32> to vector<16x16xf32>
      %67 = arith.addf %64, %66 : vector<16x16xf32>
      %c0_47 = arith.constant 0 : index
      %c0_48 = arith.constant 0 : index
      %c0_49 = arith.constant 0 : index
      %68 = vector.load %arg4[%c0_47, %c0_48, %c0_49] : memref<1x32x16xf32, #tpu.memory_space<vmem>>, vector<1x16x16xf32>
      %69 = vector.shape_cast %68 : vector<1x16x16xf32> to vector<16x16xf32>
      %c0_50 = arith.constant 0 : index
      %c0_51 = arith.constant 0 : index
      %70 = vector.load %arg16[%c0_50, %c0_51] : memref<16x16xf32, #tpu.memory_space<vmem>>, vector<16x16xf32>
      %cst_52 = arith.constant dense<0.000000e+00> : vector<16x16xf32>
      %71 = tpu.matmul %69, %70, %cst_52 {dimension_numbers = #tpu.dot_dimension_numbers<[1], [0], [0], [1], [0, 0, 1, 1], [], []>} : vector<16x16xf32>, vector<16x16xf32>, vector<16x16xf32> -> vector<16x16xf32>
      %c0_53 = arith.constant 0 : index
      %c0_54 = arith.constant 0 : index
      %72 = vector.load %arg17[%c0_53, %c0_54] : memref<1x16xf32, #tpu.memory_space<vmem>>, vector<1x16xf32>
      %73 = vector.broadcast %72 : vector<1x16xf32> to vector<16x16xf32>
      %74 = arith.addf %71, %73 : vector<16x16xf32>
      %c0_55 = arith.constant 0 : index
      %c0_56 = arith.constant 0 : index
      %75 = vector.load %arg12[%c0_55, %c0_56] : memref<32x32xf32, #tpu.memory_space<vmem>>, vector<16x32xf32>
      %cst_57 = arith.constant dense<0.000000e+00> : vector<32x16xf32>
      %76 = tpu.matmul %75, %67, %cst_57 {dimension_numbers = #tpu.dot_dimension_numbers<[0], [0], [1], [1], [0, 1, 1, 1], [], []>} : vector<16x32xf32>, vector<16x16xf32>, vector<32x16xf32> -> vector<32x16xf32>
      %77 = vector.extract_strided_slice %60 {offsets = [0, 0], sizes = [1, 16], strides = [1, 1]} : vector<1x32xf32> to vector<1x16xf32>
      %cst_58 = arith.constant dense<0.000000e+00> : vector<1x16xf32>
      %78 = tpu.matmul %77, %67, %cst_58 {dimension_numbers = #tpu.dot_dimension_numbers<[1], [0], [0], [1], [0, 0, 1, 1], [], []>} : vector<1x16xf32>, vector<16x16xf32>, vector<1x16xf32> -> vector<1x16xf32>
      %c0_59 = arith.constant 0 : index
      %c0_60 = arith.constant 0 : index
      %79 = vector.load %arg11[%c0_59, %c0_60] : memref<32x32xf32, #tpu.memory_space<vmem>>, vector<16x32xf32>
      %cst_61 = arith.constant dense<0.000000e+00> : vector<16x32xf32>
      %80 = tpu.matmul %74, %79, %cst_61 {dimension_numbers = #tpu.dot_dimension_numbers<[0], [0], [1], [1], [0, 1, 1, 1], [], []>} : vector<16x16xf32>, vector<16x32xf32>, vector<16x32xf32> -> vector<16x32xf32>
      %c0_62 = arith.constant 0 : index
      %c0_63 = arith.constant 0 : index
      %81 = vector.load %arg19[%c0_62, %c0_63] : memref<32x32xf32, #tpu.memory_space<vmem>>, vector<32x16xf32>
      tpu.vector_store %arg19[%c0_62, %c0_63], %76 {strides = array<i32>} : memref<32x32xf32, #tpu.memory_space<vmem>>, vector<32x16xf32>,
      %c0_64 = arith.constant 0 : index
      %c0_65 = arith.constant 0 : index
      %82 = vector.load %arg21[%c0_64, %c0_65] : memref<1x32xf32, #tpu.memory_space<vmem>>, vector<1x16xf32>
      tpu.vector_store %arg21[%c0_64, %c0_65], %78 {strides = array<i32>} : memref<1x32xf32, #tpu.memory_space<vmem>>, vector<1x16xf32>,
      %c0_66 = arith.constant 0 : index
      %c0_67 = arith.constant 0 : index
      %83 = vector.load %arg20[%c0_66, %c0_67] : memref<32x32xf32, #tpu.memory_space<vmem>>, vector<16x32xf32>
      tpu.vector_store %arg20[%c0_66, %c0_67], %80 {strides = array<i32>} : memref<32x32xf32, #tpu.memory_space<vmem>>, vector<16x32xf32>,
      %c0_68 = arith.constant 0 : index
      %c16_69 = arith.constant 16 : index
      %c0_70 = arith.constant 0 : index
      %84 = vector.load %arg3[%c0_68, %c16_69, %c0_70] : memref<1x32x16xf32, #tpu.memory_space<vmem>>, vector<1x16x16xf32>
      %85 = vector.shape_cast %84 : vector<1x16x16xf32> to vector<16x16xf32>
      %c0_71 = arith.constant 0 : index
      %c0_72 = arith.constant 0 : index
      %86 = vector.load %arg14[%c0_71, %c0_72] : memref<16x16xf32, #tpu.memory_space<vmem>>, vector<16x16xf32>
      %cst_73 = arith.constant dense<0.000000e+00> : vector<16x16xf32>
      %87 = tpu.matmul %85, %86, %cst_73 {dimension_numbers = #tpu.dot_dimension_numbers<[1], [0], [0], [1], [0, 0, 1, 1], [], []>} : vector<16x16xf32>, vector<16x16xf32>, vector<16x16xf32> -> vector<16x16xf32>
      %c0_74 = arith.constant 0 : index
      %c0_75 = arith.constant 0 : index
      %88 = vector.load %arg15[%c0_74, %c0_75] : memref<1x16xf32, #tpu.memory_space<vmem>>, vector<1x16xf32>
      %89 = vector.broadcast %88 : vector<1x16xf32> to vector<16x16xf32>
      %90 = arith.addf %87, %89 : vector<16x16xf32>
      %c0_76 = arith.constant 0 : index
      %c16_77 = arith.constant 16 : index
      %c0_78 = arith.constant 0 : index
      %91 = vector.load %arg4[%c0_76, %c16_77, %c0_78] : memref<1x32x16xf32, #tpu.memory_space<vmem>>, vector<1x16x16xf32>
      %92 = vector.shape_cast %91 : vector<1x16x16xf32> to vector<16x16xf32>
      %c0_79 = arith.constant 0 : index
      %c0_80 = arith.constant 0 : index
      %93 = vector.load %arg16[%c0_79, %c0_80] : memref<16x16xf32, #tpu.memory_space<vmem>>, vector<16x16xf32>
      %cst_81 = arith.constant dense<0.000000e+00> : vector<16x16xf32>
      %94 = tpu.matmul %92, %93, %cst_81 {dimension_numbers = #tpu.dot_dimension_numbers<[1], [0], [0], [1], [0, 0, 1, 1], [], []>} : vector<16x16xf32>, vector<16x16xf32>, vector<16x16xf32> -> vector<16x16xf32>
      %c0_82 = arith.constant 0 : index
      %c0_83 = arith.constant 0 : index
      %95 = vector.load %arg17[%c0_82, %c0_83] : memref<1x16xf32, #tpu.memory_space<vmem>>, vector<1x16xf32>
      %96 = vector.broadcast %95 : vector<1x16xf32> to vector<16x16xf32>
      %97 = arith.addf %94, %96 : vector<16x16xf32>
      %c16_84 = arith.constant 16 : index
      %c0_85 = arith.constant 0 : index
      %98 = vector.load %arg12[%c16_84, %c0_85] : memref<32x32xf32, #tpu.memory_space<vmem>>, vector<16x32xf32>
      %cst_86 = arith.constant dense<0.000000e+00> : vector<32x16xf32>
      %99 = tpu.matmul %98, %90, %cst_86 {dimension_numbers = #tpu.dot_dimension_numbers<[0], [0], [1], [1], [0, 1, 1, 1], [], []>} : vector<16x32xf32>, vector<16x16xf32>, vector<32x16xf32> -> vector<32x16xf32>
      %100 = vector.extract_strided_slice %60 {offsets = [0, 16], sizes = [1, 16], strides = [1, 1]} : vector<1x32xf32> to vector<1x16xf32>
      %cst_87 = arith.constant dense<0.000000e+00> : vector<1x16xf32>
      %101 = tpu.matmul %100, %90, %cst_87 {dimension_numbers = #tpu.dot_dimension_numbers<[1], [0], [0], [1], [0, 0, 1, 1], [], []>} : vector<1x16xf32>, vector<16x16xf32>, vector<1x16xf32> -> vector<1x16xf32>
      %c16_88 = arith.constant 16 : index
      %c0_89 = arith.constant 0 : index
      %102 = vector.load %arg11[%c16_88, %c0_89] : memref<32x32xf32, #tpu.memory_space<vmem>>, vector<16x32xf32>
      %cst_90 = arith.constant dense<0.000000e+00> : vector<16x32xf32>
      %103 = tpu.matmul %97, %102, %cst_90 {dimension_numbers = #tpu.dot_dimension_numbers<[0], [0], [1], [1], [0, 1, 1, 1], [], []>} : vector<16x16xf32>, vector<16x32xf32>, vector<16x32xf32> -> vector<16x32xf32>
      %c0_91 = arith.constant 0 : index
      %c16_92 = arith.constant 16 : index
      %104 = vector.load %arg19[%c0_91, %c16_92] : memref<32x32xf32, #tpu.memory_space<vmem>>, vector<32x16xf32>
      tpu.vector_store %arg19[%c0_91, %c16_92], %99 {strides = array<i32>} : memref<32x32xf32, #tpu.memory_space<vmem>>, vector<32x16xf32>,
      %c0_93 = arith.constant 0 : index
      %c16_94 = arith.constant 16 : index
      %105 = vector.load %arg21[%c0_93, %c16_94] : memref<1x32xf32, #tpu.memory_space<vmem>>, vector<1x16xf32>
      tpu.vector_store %arg21[%c0_93, %c16_94], %101 {strides = array<i32>} : memref<1x32xf32, #tpu.memory_space<vmem>>, vector<1x16xf32>,
      %c16_95 = arith.constant 16 : index
      %c0_96 = arith.constant 0 : index
      %106 = vector.load %arg20[%c16_95, %c0_96] : memref<32x32xf32, #tpu.memory_space<vmem>>, vector<16x32xf32>
      tpu.vector_store %arg20[%c16_95, %c0_96], %103 {strides = array<i32>} : memref<32x32xf32, #tpu.memory_space<vmem>>, vector<16x32xf32>,
    } else {
    }
    %c0 = arith.constant 0 : index
    %c0_1 = arith.constant 0 : index
    %c0_2 = arith.constant 0 : index
    %3 = vector.load %arg2[%c0, %c0_1, %c0_2] : memref<1x8x32xf32, #tpu.memory_space<vmem>>, vector<1x8x32xf32>
    %4 = vector.shape_cast %3 : vector<1x8x32xf32> to vector<8x32xf32>
    %c0_3 = arith.constant 0 : index
    %c0_4 = arith.constant 0 : index
    %5 = vector.load %arg5[%c0_3, %c0_4] : memref<32x32xf32, #tpu.memory_space<vmem>>, vector<32x32xf32>
    %cst = arith.constant dense<0.000000e+00> : vector<8x32xf32>
    %6 = tpu.matmul %4, %5, %cst {dimension_numbers = #tpu.dot_dimension_numbers<[1], [0], [0], [1], [0, 0, 1, 1], [], []>} : vector<8x32xf32>, vector<32x32xf32>, vector<8x32xf32> -> vector<8x32xf32>
    %c0_5 = arith.constant 0 : index
    %c0_6 = arith.constant 0 : index
    %7 = vector.load %arg6[%c0_5, %c0_6] : memref<1x32xf32, #tpu.memory_space<vmem>>, vector<1x32xf32>
    %8 = vector.broadcast %7 : vector<1x32xf32> to vector<8x32xf32>
    %9 = arith.addf %6, %8 : vector<8x32xf32>
    %c0_7 = arith.constant 0 : index
    %c0_8 = arith.constant 0 : index
    %10 = vector.load %arg7[%c0_7, %c0_8] : memref<32x32xf32, #tpu.memory_space<vmem>>, vector<32x32xf32>
    %cst_9 = arith.constant dense<0.000000e+00> : vector<8x32xf32>
    %11 = tpu.matmul %9, %10, %cst_9 {dimension_numbers = #tpu.dot_dimension_numbers<[1], [0], [0], [1], [0, 0, 1, 1], [], []>} : vector<8x32xf32>, vector<32x32xf32>, vector<8x32xf32> -> vector<8x32xf32>
    %c0_10 = arith.constant 0 : index
    %c0_11 = arith.constant 0 : index
    %12 = vector.load %arg8[%c0_10, %c0_11] : memref<1x32xf32, #tpu.memory_space<vmem>>, vector<1x32xf32>
    %13 = vector.broadcast %12 : vector<1x32xf32> to vector<8x32xf32>
    %14 = arith.addf %11, %13 : vector<8x32xf32>
    %c0_12 = arith.constant 0 : index
    %c0_13 = arith.constant 0 : index
    %15 = vector.load %arg9[%c0_12, %c0_13] : memref<32x32xf32, #tpu.memory_space<vmem>>, vector<32x32xf32>
    %cst_14 = arith.constant dense<0.000000e+00> : vector<8x32xf32>
    %16 = tpu.matmul %14, %15, %cst_14 {dimension_numbers = #tpu.dot_dimension_numbers<[1], [0], [0], [1], [0, 0, 1, 1], [], []>} : vector<8x32xf32>, vector<32x32xf32>, vector<8x32xf32> -> vector<8x32xf32>
    %c0_15 = arith.constant 0 : index
    %c0_16 = arith.constant 0 : index
    %17 = vector.load %arg10[%c0_15, %c0_16] : memref<1x32xf32, #tpu.memory_space<vmem>>, vector<1x32xf32>
    %18 = vector.broadcast %17 : vector<1x32xf32> to vector<8x32xf32>
    %19 = arith.addf %16, %18 : vector<8x32xf32>
    %c0_17 = arith.constant 0 : index
    %c0_18 = arith.constant 0 : index
    %20 = vector.load %arg19[%c0_17, %c0_18] : memref<32x32xf32, #tpu.memory_space<vmem>>, vector<32x32xf32>
    %cst_19 = arith.constant dense<0.000000e+00> : vector<8x32xf32>
    %21 = tpu.matmul %19, %20, %cst_19 {dimension_numbers = #tpu.dot_dimension_numbers<[1], [0], [0], [1], [0, 0, 1, 1], [], []>} : vector<8x32xf32>, vector<32x32xf32>, vector<8x32xf32> -> vector<8x32xf32>
    %c0_20 = arith.constant 0 : index
    %c0_21 = arith.constant 0 : index
    %22 = vector.load %arg21[%c0_20, %c0_21] : memref<1x32xf32, #tpu.memory_space<vmem>>, vector<1x32xf32>
    %23 = vector.broadcast %22 : vector<1x32xf32> to vector<8x32xf32>
    %24 = arith.addf %21, %23 : vector<8x32xf32>
    %cst_22 = arith.constant 0.000000e+00 : f32
    %25 = vector.broadcast %cst_22 : f32 to vector<8x32xf32>
    %26 = vector.extract_strided_slice %24 {offsets = [0, 0], sizes = [8, 16], strides = [1, 1]} : vector<8x32xf32> to vector<8x16xf32>
    %cst_23 = arith.constant dense<0xFF800000> : vector<8xf32>
    %27 = vector.multi_reduction <maximumf>, %26, %cst_23 [1] : vector<8x16xf32> to vector<8xf32>
    %28 = vector.shape_cast %27 : vector<8xf32> to vector<8x1xf32>
    %29 = vector.broadcast %28 : vector<8x1xf32> to vector<8x16xf32>
    %30 = arith.subf %26, %29 : vector<8x16xf32>
    %31 = math.exp %30 : vector<8x16xf32>
    %cst_24 = arith.constant dense<0.000000e+00> : vector<8xf32>
    %32 = vector.multi_reduction <add>, %31, %cst_24 [1] : vector<8x16xf32> to vector<8xf32>
    %33 = vector.shape_cast %32 : vector<8xf32> to vector<8x1xf32>
    %34 = tpu.reciprocal %33 : vector<8x1xf32> -> vector<8x1xf32>
    %35 = vector.broadcast %34 : vector<8x1xf32> to vector<8x16xf32>
    %36 = arith.mulf %31, %35 : vector<8x16xf32>
    %c0_25 = arith.constant 0 : index
    %c0_26 = arith.constant 0 : index
    %37 = vector.load %arg20[%c0_25, %c0_26] : memref<32x32xf32, #tpu.memory_space<vmem>>, vector<16x32xf32>
    %cst_27 = arith.constant dense<0.000000e+00> : vector<8x32xf32>
    %38 = tpu.matmul %36, %37, %cst_27 {dimension_numbers = #tpu.dot_dimension_numbers<[1], [0], [0], [1], [0, 0, 1, 1], [], []>} : vector<8x16xf32>, vector<16x32xf32>, vector<8x32xf32> -> vector<8x32xf32>
    %39 = arith.addf %25, %38 : vector<8x32xf32>
    %40 = vector.extract_strided_slice %24 {offsets = [0, 16], sizes = [8, 16], strides = [1, 1]} : vector<8x32xf32> to vector<8x16xf32>
    %cst_28 = arith.constant dense<0xFF800000> : vector<8xf32>
    %41 = vector.multi_reduction <maximumf>, %40, %cst_28 [1] : vector<8x16xf32> to vector<8xf32>
    %42 = vector.shape_cast %41 : vector<8xf32> to vector<8x1xf32>
    %43 = vector.broadcast %42 : vector<8x1xf32> to vector<8x16xf32>
    %44 = arith.subf %40, %43 : vector<8x16xf32>
    %45 = math.exp %44 : vector<8x16xf32>
    %cst_29 = arith.constant dense<0.000000e+00> : vector<8xf32>
    %46 = vector.multi_reduction <add>, %45, %cst_29 [1] : vector<8x16xf32> to vector<8xf32>
    %47 = vector.shape_cast %46 : vector<8xf32> to vector<8x1xf32>
    %48 = tpu.reciprocal %47 : vector<8x1xf32> -> vector<8x1xf32>
    %49 = vector.broadcast %48 : vector<8x1xf32> to vector<8x16xf32>
    %50 = arith.mulf %45, %49 : vector<8x16xf32>
    %c16 = arith.constant 16 : index
    %c0_30 = arith.constant 0 : index
    %51 = vector.load %arg20[%c16, %c0_30] : memref<32x32xf32, #tpu.memory_space<vmem>>, vector<16x32xf32>
    %cst_31 = arith.constant dense<0.000000e+00> : vector<8x32xf32>
    %52 = tpu.matmul %50, %51, %cst_31 {dimension_numbers = #tpu.dot_dimension_numbers<[1], [0], [0], [1], [0, 0, 1, 1], [], []>} : vector<8x16xf32>, vector<16x32xf32>, vector<8x32xf32> -> vector<8x32xf32>
    %53 = arith.addf %39, %52 : vector<8x32xf32>
    %c0_32 = arith.constant 0 : index
    %c0_33 = arith.constant 0 : index
    %54 = vector.load %arg13[%c0_32, %c0_33] : memref<1x32xf32, #tpu.memory_space<vmem>>, vector<1x32xf32>
    %55 = vector.broadcast %54 : vector<1x32xf32> to vector<8x32xf32>
    %56 = arith.addf %53, %55 : vector<8x32xf32>
    %c0_34 = arith.constant 0 : index
    %c0_35 = arith.constant 0 : index
    %c0_36 = arith.constant 0 : index
    %57 = vector.load %arg18[%c0_34, %c0_35, %c0_36] : memref<1x8x32xf32, #tpu.memory_space<vmem>>, vector<1x8x32xf32>
    %58 = vector.shape_cast %57 : vector<1x8x32xf32> to vector<8x32xf32>
    %59 = vector.shape_cast %56 : vector<8x32xf32> to vector<1x8x32xf32>
    tpu.vector_store %arg18[%c0_34, %c0_35, %c0_36], %59 {strides = array<i32>} : memref<1x8x32xf32, #tpu.memory_space<vmem>>, vector<1x8x32xf32>,
    return
  }
  func.func @transform_0(%arg0: i32, %arg1: i32) -> (i32, i32, i32) {
    %c0_i32 = arith.constant 0 : i32
    %c0_i32_0 = arith.constant 0 : i32
    return %arg0, %arg1, %c0_i32 : i32, i32, i32
  }
  func.func @transform_1(%arg0: i32, %arg1: i32) -> (i32, i32, i32) {
    %c0_i32 = arith.constant 0 : i32
    %c0_i32_0 = arith.constant 0 : i32
    %c0_i32_1 = arith.constant 0 : i32
    return %arg0, %c0_i32, %c0_i32_0 : i32, i32, i32
  }
  func.func @transform_2(%arg0: i32, %arg1: i32) -> (i32, i32, i32) {
    %c0_i32 = arith.constant 0 : i32
    %c0_i32_0 = arith.constant 0 : i32
    %c0_i32_1 = arith.constant 0 : i32
    return %arg0, %c0_i32, %c0_i32_0 : i32, i32, i32
  }
  func.func @transform_3(%arg0: i32, %arg1: i32) -> (i32, i32) {
    %c0_i32 = arith.constant 0 : i32
    %c0_i32_0 = arith.constant 0 : i32
    %c0_i32_1 = arith.constant 0 : i32
    return %c0_i32, %c0_i32_0 : i32, i32
  }
  func.func @transform_4(%arg0: i32, %arg1: i32) -> (i32, i32) {
    %c0_i32 = arith.constant 0 : i32
    %c0_i32_0 = arith.constant 0 : i32
    %c0_i32_1 = arith.constant 0 : i32
    return %c0_i32, %c0_i32_0 : i32, i32
  }
  func.func @transform_5(%arg0: i32, %arg1: i32) -> (i32, i32) {
    %c0_i32 = arith.constant 0 : i32
    %c0_i32_0 = arith.constant 0 : i32
    %c0_i32_1 = arith.constant 0 : i32
    return %c0_i32, %c0_i32_0 : i32, i32
  }
  func.func @transform_6(%arg0: i32, %arg1: i32) -> (i32, i32) {
    %c0_i32 = arith.constant 0 : i32
    %c0_i32_0 = arith.constant 0 : i32
    %c0_i32_1 = arith.constant 0 : i32
    return %c0_i32, %c0_i32_0 : i32, i32
  }
  func.func @transform_7(%arg0: i32, %arg1: i32) -> (i32, i32) {
    %c0_i32 = arith.constant 0 : i32
    %c0_i32_0 = arith.constant 0 : i32
    %c0_i32_1 = arith.constant 0 : i32
    return %c0_i32, %c0_i32_0 : i32, i32
  }
  func.func @transform_8(%arg0: i32, %arg1: i32) -> (i32, i32) {
    %c0_i32 = arith.constant 0 : i32
    %c0_i32_0 = arith.constant 0 : i32
    %c0_i32_1 = arith.constant 0 : i32
    return %c0_i32, %c0_i32_0 : i32, i32
  }
  func.func @transform_9(%arg0: i32, %arg1: i32) -> (i32, i32) {
    %c0_i32 = arith.constant 0 : i32
    %c0_i32_0 = arith.constant 0 : i32
    %c0_i32_1 = arith.constant 0 : i32
    return %c0_i32, %c0_i32_0 : i32, i32
  }
  func.func @transform_10(%arg0: i32, %arg1: i32) -> (i32, i32) {
    %c0_i32 = arith.constant 0 : i32
    %c0_i32_0 = arith.constant 0 : i32
    %c0_i32_1 = arith.constant 0 : i32
    return %c0_i32, %c0_i32_0 : i32, i32
  }
  func.func @transform_11(%arg0: i32, %arg1: i32) -> (i32, i32) {
    %c0_i32 = arith.constant 0 : i32
    %c0_i32_0 = arith.constant 0 : i32
    %c0_i32_1 = arith.constant 0 : i32
    return %c0_i32, %c0_i32_0 : i32, i32
  }
  func.func @transform_12(%arg0: i32, %arg1: i32) -> (i32, i32) {
    %c0_i32 = arith.constant 0 : i32
    %c0_i32_0 = arith.constant 0 : i32
    %c0_i32_1 = arith.constant 0 : i32
    return %c0_i32, %c0_i32_0 : i32, i32
  }
  func.func @transform_13(%arg0: i32, %arg1: i32) -> (i32, i32) {
    %c0_i32 = arith.constant 0 : i32
    %c0_i32_0 = arith.constant 0 : i32
    %c0_i32_1 = arith.constant 0 : i32
    return %c0_i32, %c0_i32_0 : i32, i32
  }
  func.func @transform_14(%arg0: i32, %arg1: i32) -> (i32, i32) {
    %c0_i32 = arith.constant 0 : i32
    %c0_i32_0 = arith.constant 0 : i32
    %c0_i32_1 = arith.constant 0 : i32
    return %c0_i32, %c0_i32_0 : i32, i32
  }
  func.func @transform_15(%arg0: i32, %arg1: i32) -> (i32, i32) {
    %c0_i32 = arith.constant 0 : i32
    %c0_i32_0 = arith.constant 0 : i32
    %c0_i32_1 = arith.constant 0 : i32
    return %c0_i32, %c0_i32_0 : i32, i32
  }
  func.func @transform_16(%arg0: i32, %arg1: i32) -> (i32, i32, i32) {
    %c0_i32 = arith.constant 0 : i32
    %c0_i32_0 = arith.constant 0 : i32
    return %arg0, %arg1, %c0_i32 : i32, i32, i32
  }
}

</mosaic_0001>

<bundles_post_ra>
// kernel: tpu_custom_call.1
= control target key start
LH: loop header
LB: loop body
LE: loop exit
PB: predicated region body
PF: predicated region fallthrough
CT: control target
= control target key end

     0   :  { %s2252_s0 = inlined_call_operand.hbm [shape: f32[2,8,32], index: 0, kind: input, shape index: {}]   ;;  %s2253_s1 = inlined_call_operand.vmem [shape: f32[2,32,16], index: 1, kind: input, shape index: {}]   ;;  %s2254_s2 = inlined_call_operand.vmem [shape: f32[2,32,16], index: 2, kind: input, shape index: {}]   ;;  %s2255_s3 = inlined_call_operand.vmem [shape: f32[32,32], index: 3, kind: input, shape index: {}]   ;;  %s2256_s4 = inlined_call_operand.vmem [shape: f32[1,32], index: 4, kind: input, shape index: {}]   ;;  %s2257_s5 = inlined_call_operand.vmem [shape: f32[32,32], index: 5, kind: input, shape index: {}]   ;;  %s2258_s6 = inlined_call_operand.vmem [shape: f32[1,32], index: 6, kind: input, shape index: {}]   ;;  %s2259_s7 = inlined_call_operand.vmem [shape: f32[32,32], index: 7, kind: input, shape index: {}]   ;;  %s2260_s8 = inlined_call_operand.vmem [shape: f32[1,32], index: 8, kind: input, shape index: {}]   ;;  %s2261_s9 = inlined_call_operand.vmem [shape: f32[32,32], index: 9, kind: input, shape index: {}]   ;;  %s2262_s10 = inlined_call_operand.vmem [shape: f32[32,32], index: 10, kind: input, shape index: {}]   ;;  %s2263_s11 = inlined_call_operand.vmem [shape: f32[1,32], index: 11, kind: input, shape index: {}]   ;;  %s2264_s12 = inlined_call_operand.hbm [shape: f32[16,16], index: 12, kind: input, shape index: {}]   ;;  %s2265_s13 = inlined_call_operand.vmem [shape: f32[1,16], index: 13, kind: input, shape index: {}]   ;;  %s2266_s14 = inlined_call_operand.hbm [shape: f32[16,16], index: 14, kind: input, shape index: {}]   ;;  %s2267_s15 = inlined_call_operand.vmem [shape: f32[1,16], index: 15, kind: input, shape index: {}]   ;;  %s2268_s16 = inlined_call_operand.hbm [shape: f32[2,8,32], index: 16, kind: output, shape index: {}]  }
   0x1   :  { %2275 = sst [smem:[#allocation17_spill]] %s2252_s0 }
   0x2   :  { %2276 = sst [smem:[#allocation18_spill]] %s2256_s4 }
   0x3   :  { %2277 = sst [smem:[#allocation19_spill]] %s2257_s5 }
   0x4   :  { %2278 = sst [smem:[#allocation20_spill]] %s2258_s6 }
   0x5   :  { %2279 = sst [smem:[#allocation21_spill]] %s2259_s7 }
   0x6   :  { %2280 = sst [smem:[#allocation22_spill]] %s2260_s8 }
   0x7   :  { %2281 = sst [smem:[#allocation23_spill]] %s2264_s12 }
   0x8   :  { %2282 = sst [smem:[#allocation24_spill]] %s2266_s14 }
   0x9   :  { %2283 = sst [smem:[#allocation25_spill]] %s2268_s16 }
   0xa   :  { %21 = vsyncpa [#allocation6], 0 }
   0xb   :  { %23 = vsyncpa [#allocation6 + $0x1], 0 }
   0xc   :  { %24 = vsyncpa [#allocation9], 0 }
   0xd   :  { %25 = vsyncpa [#allocation7], 0 }
   0xe   :  { %27 = vsyncpa [#allocation7 + $0x1], 0  ;;  %s1949_s21 = smov 0   ;;  %s1951_s22 = smov 0  }
   0xf   :  { %s1953_s23 = smov 0   ;;  %s1955_s24 = smov 0  }
  0x10   :  { %s1957_s25 = smov 0   ;;  %s1959_s26 = smov 0  }
  0x11 LB: > { %2284 = sst [smem:[#allocation15_spill]] %s1836_s21  ;;  %s2269_s27 = sadd.s32 4294967295, %s1856_s26   ;;  %s1856_s26 = sphi %s1959_s26, %s33_s26   ;;  %s1852_s25 = sphi %s1957_s25, %s2308_s25   ;;  %s1848_s24 = sphi %s1955_s24, %s2307_s24   ;;  %s1844_s23 = sphi %s1953_s23, %s2306_s23   ;;  %s1840_s22 = sphi %s1951_s22, %s2305_s22   ;;  %s1836_s21 = sphi %s1949_s21, %s2304_s21  }
  0x12   : > { %p1525_p0 = scmp.ge.s32.totalorder %s1856_s26, 1  ;;  %p1983_p1 = scmp.eq.s32.totalorder %s2269_s27, 0 }
  0x13   : > { %p431_p2 = scmp.lt.s32.totalorder %s1856_s26, 3  ;;  %s2286_s12 = sld [smem:[#allocation23_spill]] }
  0x14   : > { %s1858_s18 = smov [#allocation8]   ;;  %p1528_p6 = scmp.ge.s32.totalorder %s1856_s26, 2 }
  0x15   : > { %p1991_p3 = pnand %p1525_p0, %p431_p2  ;;  %s471_s19 = sshll.u32 %s1858_s18, 4  ;;  %s472_s19 = int_to_ptr.vmem [resolvable:$true] %s471_s19 }
  0x16   : > { %s2288_s14 = sld [smem:[#allocation24_spill]]  ;;  %s1859_s27 = smov 128  }
  0x17   : > { %p1586_p4 = pneg %p1991_p3  ;;  %s1861_s18 = smov [#allocation10]  }
  0x18   : > { %s488_s16 = sshll.u32 %s1861_s18, 4  ;;  %s45_s8 = sadd.s32 1, %s1852_s25  ;;  %s489_s16 = int_to_ptr.vmem [resolvable:$true] %s488_s16 }
  0x19   : > { %s469_s0 = sshll.u32 %s2286_s12, 4  ;;  %p1587_p5 = pnand %p1586_p4, %p1983_p1  ;;  %s470_s0 = int_to_ptr.hbm [resolvable:$true] %s469_s0 }
  0x1a   : > { %s1860_s12 = smov 8   ;;  %s1524_s6 = sadd.s32 4294967294, %s1856_s26  }
  0x1b   : > { %1589 = dma.hbm_to_vmem [thread:$0]  (!%p1587_p5), %s470_s0, 256, %s472_s19, [#allocation9], %s1859_s27, %s1859_s27, %s1860_s12  }
  0x1c   : > { %s486_s30 = sshll.u32 %s2288_s14, 4  ;;  %p47_p7 = scmp.ge.s32.totalorder %s45_s8, 2  ;;  %s487_s30 = int_to_ptr.hbm [resolvable:$true] %s486_s30 }
  0x1d   : > { %1592 = dma.hbm_to_vmem [thread:$0]  (!%p1587_p5), %s487_s30, 256, %s489_s16, [#allocation9], %s1859_s27, %s1859_s27, %s1860_s12  }
  0x1e   : > { %s54_s20 = sadd.s32 1, %s1844_s23  ;;  %p61_p8 = scmp.ne.s32.totalorder %s1844_s23, %s1840_s22 }
  0x1f   : > { %s2310_s8 = smov (%p47_p7, %s45_s8), 0  ;;  %p62_p9 = scmp.eq.s32.totalorder %s1856_s26, 0 }
  0x20   : > { %2289 = sst [smem:[#allocation16_spill]] %s2310_s8  ;;  %p67_p10 = scmp.ne.s32.totalorder %s1840_s22, %s1836_s21 }
  0x21   : > { %s49_s0 = ssub.s32 %s1852_s25, %s2310_s8  ;;  %s2290_s19 = sadd.s32 4294967295, %s1856_s26  }
  0x22   : > { %p418_p11 = scmp.eq.s32.totalorder %s2290_s19, 1  ;;  %p52_p12 = scmp.eq.s32.totalorder %s49_s0, 0 }
  0x23   : > { %p2019_p13 = por %p1983_p1, %p67_p10  ;;  %p424_p2 = scmp.eq.s32.totalorder %s1524_s6, 1 }
  0x24   : > { %p2023_p0 = por %p418_p11, %p61_p8  ;;  %p63_p4 = por %p62_p9, %p61_p8 }
  0x25   : > { %s2028_s27 = scalar_select %p52_p12, %s1844_s23, %s54_s20  }
  0x26   : > { %p2030_p5 = por %p424_p2, %p67_p10  ;;  %s505_s30 = sand.u32 1, %s1844_s23  }
  0x27   : > { %s1530_s18 = sshll.u32 %s1852_s25, 3  ;;  %p1603_p7 = scmp.lt.s32.totalorder %s1856_s26, 2 }
  0x28   : > { %s1529_s0 = sshll.u32 %s505_s30, 3  ;;  %s2294_s8 = sld [smem:[#allocation17_spill]] }
  0x29   : > { %s509_s4 = scalar_lea.vmem [#allocation5], %s1529_s0  ;;  %p1594_p11 = pnand %p1603_p7, %p63_p4 }
  0x2a   : > { %s518_s5 = sshll.u32 %s509_s4, 4  ;;  %s506_s6 = scalar_lea.sflag [#allocation6], %s505_s30  ;;  %s519_s5 = int_to_ptr.vmem [resolvable:$true] %s518_s5 }
  0x2b   : > { %s2043_s20 = sand.u32 (!%p1991_p3), 1, %s1840_s22  }
  0x2c   : > { %543 = sbr.rel (%p1991_p3) target bundleno = 1385 (0x569), region = 84  ;;  %s1532_s14 = sshll.u32 (!%p1991_p3), %s2043_s20, 3 }
  0x2e   : > { %s514_s21 = scalar_lea.hbm %s2294_s8, %s1530_s18  ;;  %s546_s8 = scalar_lea.sflag (!%p1991_p3), [#allocation6], %s2043_s20 }
  0x2f   : > { %s516_s7 = sshll.u32 %s514_s21, 4  ;;  %s2049_s21 = scalar_lea.vmem (!%p1991_p3), [#allocation5], %s1532_s14  ;;  %s517_s7 = int_to_ptr.hbm [resolvable:$true] %s516_s7 }
  0x30   : > { %1596 = dma.hbm_to_vmem [thread:$0]  (!%p1594_p11), %s517_s7, 128, %s519_s5, %s506_s6  }
  0x31   : > { %1823 = dma.done.wait (%p2019_p13), %s546_s8, 128  }
  0x32   : > { %1825 = vsyncadd (%p2019_p13), %s546_s8, 4294967168 }
  0x33   : > { %1827 = dma.done.wait (%p1983_p1), [#allocation9], 512  }
  0x34   : > { %1829 = vsyncadd (%p1983_p1), [#allocation9], 4294966784  ;;  %p619_p3 = scmp.lt.s32.totalorder %s1848_s24, 1  ;;  %v675_v0 = vld [vmem:[#allocation10 + $0x8] sm:$0xff]  ;;  %v674_v1 = vld [vmem:[#allocation10] sm:$0xff]  ;;  %vm642_vm0 = vcmask 130048  }
  0x35   : > { %700 = vmatpush.msra.mxu1 %v675_v0  ;;  %v709_v3 = vld [vmem:[%s2262_s10] sm:$0xff]  ;;  %v636_v5 = vld [vmem:[#allocation8] sm:$0xff]  ;;  %v710_v8 = vld [vmem:[%s2262_s10 + $0x8] sm:$0xff]  ;;  %vm876_vm1 = vcmask 261120   ;;  %vm874_vm2 = vcmask 122880   ;;  %s2296_s19 = sld [smem:[#allocation18_spill]] }
  0x36   : > { %s620_s4 = scalar_select %p619_p3, %s1848_s24, 1  ;;  %711 = vxpose.xlu0.b32.start [1/2] (short) (narrow) %v709_v3, 32  ;;  %v637_v4 = vld [vmem:[#allocation8 + $0x8] sm:$0xff]  ;;  %v953_v13 = vld [vmem:[%s2262_s10 + $0x10] sm:$0xff]  ;;  %v1147_v29 = vld [vmem:[%s2255_s3 + $0x8] sm:$0xff]  ;;  %vm1132_vm3 = vcmask 261248  }
  0x37   : > { %701 = vmatpush.msra.mxu1 %v674_v1  ;;  %663 = vmatpush.msra.mxu0 %v637_v4  ;;  %v1662_v7 = vld [vmem:[%s2263_s11] ss:$0 sm:$0xff]  ;;  %v954_v14 = vld [vmem:[%s2262_s10 + $0x18] sm:$0xff]  ;;  %v1148_v27 = vld [vmem:[%s2255_s3 + $0x10] sm:$0xff]  ;;  %s2298_s7 = sld [smem:[#allocation20_spill]]  ;;  %vm1141_vm4 = vcmask 254080  }
  0x38   : > { %s1572_s5 = sshll.u32 %s620_s4, 5  ;;  %s1862_s4 = smov 112   ;;  %955 = vxpose.xlu2.b32.start [1/2] (short) (narrow) %v953_v13, 32  ;;  %v1663_v15 = vld [vmem:[%s2267_s15] ss:$0 sm:$0xff]  ;;  %v1149_v26 = vld [vmem:[%s2255_s3 + $0x18] sm:$0xff] }
  0x39   : > { %s2064_s30 = scalar_lea.vmem %s2254_s2, %s1572_s5  ;;  %s623_s0 = scalar_lea.vmem %s2253_s1, %s1572_s5  ;;  %664 = vmatpush.msra.mxu0 %v636_v5  ;;  %944 = vmatpush.msrb.mxu1 %v675_v0  ;;  %v1664_v19 = vld [vmem:[%s2265_s13] ss:$0 sm:$0xff]  ;;  %v808_v37 = vld [vmem:[%s2261_s9 + $0x8] sm:$0xff] }
  0x3a   : > { %v672_v2 = vld [vmem:[%s2064_s30] sm:$0xff]  ;;  %1029 = vrot.lane.b32.xlu1 %v1662_v7, %s1862_s4  ;;  %v673_v9 = vld [vmem:[%s2064_s30 + $0x8] sm:$0xff]  ;;  %v879_v11 = vld [vmem:[%s623_s0 + $0x10] sm:$0xff]  ;;  %s2297_s5 = sld [smem:[#allocation21_spill]] }
  0x3b   : > { %v634_v6 = vld [vmem:[%s623_s0] sm:$0xff]  ;;  %1542 = vmatmul.msk.f32.vlgmr.msra.gmra.mxu1 %vm642_vm0, %v672_v2  ;;  %907 = vmatpush.msrb.mxu0 %v637_v4  ;;  %v635_v10 = vld [vmem:[%s623_s0 + $0x8] sm:$0xff]  ;;  %v880_v12 = vld [vmem:[%s623_s0 + $0x18] sm:$0xff]  ;;  %s2295_s0 = sld [smem:[#allocation19_spill]] }
  0x3c   : > { %1540 = vmatmul.msk.f32.vlgmr.msra.gmra.mxu0 %vm642_vm0, %v634_v6  ;;  %945 = vmatpush.msrb.mxu1 %v674_v1  ;;  %v633_v25 = vld [vmem:[%s2263_s11] sm:$0x1]  ;;  %v1145_v42 = vld [vmem:[%s2049_s21] sm:$0xff]  ;;  %s2299_s12 = sld [smem:[#allocation22_spill]] }
  0x3d   : > { %908 = vmatpush.msrb.mxu0 %v636_v5  ;;  %v1665_v30 = vld [vmem:[%s2265_s13] ss:$0 sm:$0xff]  ;;  %s2300_s21 = sld [smem:[#allocation25_spill]] }
  0x3e   : > { %712 = vxpose.xlu0.b32.end [2/2] (short) (narrow) %v710_v8, 32  ;;  %v1146_v35 = vld [vmem:[%s2255_s3] sm:$0xff] }
  0x3f   : > { %v807_v38 = vld [vmem:[%s2261_s9] sm:$0xff] }
  0x40   : > { %956 = vxpose.xlu2.b32.end [2/2] (short) (narrow) %v954_v14, 32  ;;  %v1666_v57 = vld [vmem:[%s2296_s19] ss:$0 sm:$0xff]  ;;  %v1212_v61 = vld [vmem:[%s2297_s5 + $0x18] sm:$0xff]  ;;  %v1211_v62 = vld [vmem:[%s2297_s5 + $0x10] sm:$0xff]  ;;  %s1863_s19 = smov 16  }
  0x41   : > { %v1181_v44 = vld [vmem:[%s2295_s0 + $0x18] sm:$0xff]  ;;  %v1180_v45 = vld [vmem:[%s2295_s0 + $0x10] sm:$0xff]  ;;  %v1179_v47 = vld [vmem:[%s2295_s0 + $0x8] sm:$0xff] }
  0x42   : > { %v1178_v48 = vld [vmem:[%s2295_s0] sm:$0xff]  ;;  %v1210_v63 = vld [vmem:[%s2297_s5 + $0x8] sm:$0xff] }
  0x43   : > { %1543 = vmatmul.msk.f32.gmra.mxu1 %vm642_vm0, %v673_v9  ;;  %v1209_v0 = vld [vmem:[%s2297_s5] sm:$0xff] }
  0x44   : > { %1541 = vmatmul.msk.f32.gmra.mxu0 %vm642_vm0, %v635_v10  ;;  %v1667_v8 = vld [vmem:[%s2298_s7] ss:$0 sm:$0xff] }
  0x4c   : > { %1551 = vmatmul.msk.f32.vlgmr.msrb.gmra.mxu0 %vm642_vm0, %v879_v11 }
  0x54   : > { %1552 = vmatmul.msk.f32.gmra.mxu0 %vm642_vm0, %v880_v12 }
  0xac   : > { %v1030_v34 = vpop.permute.xlu1 %1029 }
  0xb8   : > { %v703_v16 = vpop.f32.mrf.mxu1 }
  0xb9   : > { %v704_v17 = vadd.f32 %v1663_v15, %v703_v16  ;;  %v666_v18 = vpop.f32.mrf.mxu0 }
  0xba   : > { %v667_v23 = vadd.f32 %v1664_v19, %v666_v18 }
  0xbb   : > { %809 = vxpose.xlu1.b32.start [1/2] (short) (narrow) %v704_v17, 16 }
  0xc0   : > { %v706_v20 = vpop.f32.mrf.mxu1 }
  0xc1   : > { %v707_v21 = vadd.f32 %v1663_v15, %v706_v20  ;;  %v669_v22 = vpop.f32.mrf.mxu0 }
  0xc2   : > { %v670_v24 = vadd.f32 %v1664_v19, %v669_v22  ;;  %v1668_v19 = vld [vmem:[%s2299_s12] ss:$0 sm:$0xff]  ;;  %s2301_s12 = smov %s2300_s21 }
  0xc3   : > { %810 = vxpose.xlu1.b32.end [2/2] (short) (narrow) %v707_v21, 16 }
  0xc4   : > { %769 = vmatpush.msra.mxu2 %v670_v24  ;;  %801 = vmatpush.msra.mxu3 %v670_v24 }
  0xc6   : > { %770 = vmatpush.msra.mxu2 %v667_v23  ;;  %802 = vmatpush.msra.mxu3 %v667_v23 }
  0xc7   : > { %1548 = vmatmul.msk.f32.vlgmr.msra.gmra.mxu3 %vm642_vm0, %v633_v25  ;;  %v916_v25 = vld [vmem:[%s2064_s30 + $0x10] sm:$0xff] }
  0xc8   : > { %1170 = vmatpush.msrb.mxu2 %v1149_v26  ;;  %861 = vmatpush.msrb.mxu3 %v808_v37  ;;  %v917_v26 = vld [vmem:[%s2064_s30 + $0x18] sm:$0xff] }
  0xc9   : > { %v910_v28 = vpop.f32.mrf.mxu0  ;;  %1553 = vmatmul.msk.f32.vlgmr.msrb.gmra.mxu1 %vm642_vm0, %v916_v25 }
  0xca   : > { %1171 = vmatpush.msrb.mxu2 %v1148_v27  ;;  %v911_v32 = vadd.f32 %v1665_v30, %v910_v28  ;;  %862 = vmatpush.msrb.mxu3 %v807_v38 }
  0xcc   : > { %1172 = vmatpush.msrb.mxu2 %v1147_v29 }
  0xce   : > { %1173 = vmatpush.msrb.mxu2 %v1146_v35 }
  0xd1   : > { %v913_v31 = vpop.f32.mrf.mxu0  ;;  %v971_v50 = vpop.trf.xlu2  ;;  %1554 = vmatmul.msk.f32.gmra.mxu1 %vm642_vm0, %v917_v26 }
  0xd2   : > { %v914_v33 = vadd.f32 %v1665_v30, %v913_v31  ;;  %v1670_v31 = vld [vmem:[%s2267_s15] ss:$0 sm:$0xff] }
  0xd4   : > { %1047 = vmatpush.msra.mxu0 %v914_v33  ;;  %1013 = vmatpush.msra.mxu3 %v914_v33 }
  0xd6   : > { %1048 = vmatpush.msra.mxu0 %v911_v32  ;;  %1014 = vmatpush.msra.mxu3 %v911_v32 }
  0xd7   : > { %1559 = vmatmul.msk.f32.vlgmr.msra.gmra.mxu0 %vm642_vm0, %v1030_v34 }
  0xd8   : > { %1201 = vmatpush.msrb.mxu0 %v1181_v44  ;;  %v1053_v44 = vld [vmem:[%s2261_s9 + $0x10] sm:$0xff] }
  0xd9   : > { %v972_v54 = vpop.trf.xlu2 }
  0xda   : > { %v727_v36 = vpop.trf.xlu0  ;;  %1202 = vmatpush.msrb.mxu0 %v1180_v45 }
  0xdb   : > { %1544 = vmatmul.msk.f32.vlgmr.msra.gmra.mxu2 %vm642_vm0, %v727_v36 }
  0xdc   : > { %1203 = vmatpush.msrb.mxu0 %v1179_v47  ;;  %1232 = vmatpush.msra.mxu2 %v1212_v61 }
  0xde   : > { %1204 = vmatpush.msrb.mxu0 %v1178_v48  ;;  %1233 = vmatpush.msra.mxu2 %v1211_v62 }
  0xe0   : > { %1234 = vmatpush.msra.mxu2 %v1210_v63 }
  0xe1   : > { %v973_v56 = vpop.trf.xlu2 }
  0xe2   : > { %v728_v39 = vpop.trf.xlu0  ;;  %1235 = vmatpush.msra.mxu2 %v1209_v0 }
  0xe3   : > { %1545 = vmatmul.msk.f32.gmra.mxu2 %vm642_vm0, %v728_v39 }
  0xe9   : > { %v974_v60 = vpop.trf.xlu2 }
  0xea   : > { %v729_v40 = vpop.trf.xlu0 }
  0xeb   : > { %1546 = vmatmul.msk.f32.gmra.mxu2 %vm642_vm0, %v729_v40 }
  0xf2   : > { %v730_v41 = vpop.trf.xlu0 }
  0xf3   : > { %1547 = vmatmul.msk.f32.gmra.mxu2 %vm642_vm0, %v730_v41 }
  0xfb   : > { %1562 = vmatmul.msk.f32.vlgmr.msrb.gmra.mxu2 %vm876_vm1, %v1145_v42 }
 0x146   : > { %v947_v32 = vpop.f32.mrf.mxu1 }
 0x147   : > { %v948_v33 = vadd.f32 %v1670_v31, %v947_v32 }
 0x14a   : > { %v804_v51 = vpop.f32.mrf.mxu3 }
 0x14b   : > { %875 = vst.msk [vmem:[#allocation4] sm:$0x1] %vm874_vm2, %v804_v51 }
 0x14e   : > { %v950_v34 = vpop.f32.mrf.mxu1 }
 0x14f   : > { %v951_v35 = vadd.f32 %v1670_v31, %v950_v34 }
 0x154   : > { %v1050_v6 = vpop.f32.mrf.mxu0 }
 0x15e   : > { %v772_v46 = vpop.f32.mrf.mxu2 }
 0x15f   : > { %v825_v43 = vpop.trf.xlu1  ;;  %870 = vst.msk [vmem:[#allocation2] sm:$0xff] %vm642_vm0, %v772_v46 }
 0x160   : > { %1549 = vmatmul.msk.f32.vlgmr.msrb.gmra.mxu3 %vm642_vm0, %v825_v43  ;;  %v1054_v43 = vld [vmem:[%s2261_s9 + $0x18] sm:$0xff] }
 0x161   : > { %1107 = vmatpush.msra.mxu1 %v1054_v43 }
 0x163   : > { %1108 = vmatpush.msra.mxu1 %v1053_v44 }
 0x166   : > { %v775_v52 = vpop.f32.mrf.mxu2 }
 0x167   : > { %v826_v49 = vpop.trf.xlu1  ;;  %871 = vst.msk [vmem:[#allocation2 + $0x8] sm:$0xff] %vm642_vm0, %v775_v52 }
 0x168   : > { %1550 = vmatmul.msk.f32.gmra.mxu3 %vm642_vm0, %v826_v49 }
 0x16e   : > { %v778_v53 = vpop.f32.mrf.mxu2 }
 0x16f   : > { %872 = vst.msk [vmem:[#allocation2 + $0x10] sm:$0xff] %vm642_vm0, %v778_v53 }
 0x170   : > { %1555 = vmatmul.msk.f32.vlgmr.msra.gmra.mxu3 %vm642_vm0, %v971_v50 }
 0x176   : > { %v781_v55 = vpop.f32.mrf.mxu2 }
 0x177   : > { %873 = vst.msk [vmem:[#allocation2 + $0x18] sm:$0xff] %vm642_vm0, %v781_v55 }
 0x178   : > { %1556 = vmatmul.msk.f32.gmra.mxu3 %vm642_vm0, %v972_v54 }
 0x17e   : > { %v1175_v58 = vpop.f32.mrf.mxu2 }
 0x17f   : > { %v1176_v59 = vadd.f32 %v1666_v57, %v1175_v58 }
 0x180   : > { %1557 = vmatmul.msk.f32.gmra.mxu3 %vm642_vm0, %v973_v56 }
 0x181   : > { %1563 = vmatmul.msk.f32.vlgmr.msrb.gmra.mxu0 %vm876_vm1, %v1176_v59 }
 0x188   : > { %1558 = vmatmul.msk.f32.gmra.mxu3 %vm642_vm0, %v974_v60 }
 0x1e3   : > { %v864_v1 = vpop.f32.mrf.mxu3 }
 0x1e4   : > { %877 = vst.msk [vmem:[#allocation3] sm:$0xff] %vm876_vm1, %v864_v1 }
 0x1eb   : > { %v867_v2 = vpop.f32.mrf.mxu3  ;;  %v1296_v5 = vld [vmem:[#allocation3] sm:$0xff] }
 0x1ec   : > { %878 = vst.msk [vmem:[#allocation3 + $0x8] sm:$0xff] %vm876_vm1, %v867_v2 }
 0x1f3   : > { %v1016_v3 = vpop.f32.mrf.mxu3  ;;  %v1297_v4 = vld [vmem:[#allocation3 + $0x8] sm:$0xff] }
 0x1f4   : > { %1371 = vmatpush.msrb.mxu2 %v1297_v4 }
 0x1f6   : > { %1372 = vmatpush.msrb.mxu2 %v1296_v5 }
 0x1fb   : > { %v1019_v7 = vpop.f32.mrf.mxu3 }
 0x1fc   : > { %1122 = vrot.lane.b32.xlu1 %v1019_v7, %s1863_s19 }
 0x1fe   : > { %v1206_v9 = vpop.f32.mrf.mxu0 }
 0x1ff   : > { %v1207_v10 = vadd.f32 %v1667_v8, %v1206_v9 }
 0x201   : > { %1564 = vmatmul.msk.f32.vlgmr.msra.gmra.mxu2 %vm876_vm1, %v1207_v10 }
 0x203   : > { %v1022_v11 = vpop.f32.mrf.mxu3 }
 0x204   : > { %1124 = vrot.lane.b32.xlu2 %v1022_v11, %s1863_s19 }
 0x20b   : > { %v1025_v12 = vpop.f32.mrf.mxu3 }
 0x20c   : > { %1120 = vrot.lane.b32.xlu2 %v1016_v3, %s1863_s19  ;;  %1126 = vrot.lane.b32.xlu0 %v1025_v12, %s1863_s19 }
 0x214   : > { %1138 = vrot.lane.b32.xlu0 %v1050_v6, %s1863_s19  ;;  %s618_s19 = scalar_lea.vmem [#allocation11], %s1532_s14  ;;  %s1790_s14 = scalar_lea.hbm %s2301_s12, 16 }
 0x215   : > { %s1397_s6 = sshll.u32 %s618_s19, 4  ;;  %s1398_s6 = int_to_ptr.vmem [resolvable:$true] %s1397_s6 }
 0x236   : > { %1055 = vxpose.xlu0.b32.start [1/2] (short) (narrow) %v948_v33, 16 }
 0x23e   : > { %1056 = vxpose.xlu0.b32.end [2/2] (short) (narrow) %v951_v35, 16 }
 0x25e   : > { %v1125_v13 = vpop.permute.xlu2 %1124 }
 0x25f   : > { %1135 = vst.msk [vmem:[#allocation2 + $0x10] sm:$0xff] %vm1132_vm3, %v1125_v13 }
 0x266   : > { %v1121_v14 = vpop.permute.xlu2 %1120  ;;  %v1242_v21 = vld [vmem:[#allocation2 + $0x10] sm:$0xff] }
 0x267   : > { %1133 = vst.msk [vmem:[#allocation2] sm:$0xff] %vm1132_vm3, %v1121_v14 }
 0x26e   : > { %v1123_v15 = vpop.permute.xlu1 %1122  ;;  %v1240_v24 = vld [vmem:[#allocation2] sm:$0xff] }
 0x26f   : > { %1134 = vst.msk [vmem:[#allocation2 + $0x8] sm:$0xff] %vm1132_vm3, %v1123_v15 }
 0x276   : > { %v1241_v23 = vld [vmem:[#allocation2 + $0x8] sm:$0xff] }
 0x27e   : > { %v1127_v16 = vpop.permute.xlu0 %1126 }
 0x27f   : > { %1136 = vst.msk [vmem:[#allocation2 + $0x18] sm:$0xff] %vm1132_vm3, %v1127_v16 }
 0x284   : > { %v1237_v20 = vpop.f32.mrf.mxu2 }
 0x285   : > { %v1238_v22 = vadd.f32 %v1668_v19, %v1237_v20 }
 0x286   : > { %v1139_v17 = vpop.permute.xlu0 %1138  ;;  %v1243_v18 = vld [vmem:[#allocation2 + $0x18] sm:$0xff] }
 0x287   : > { %1142 = vst.msk [vmem:[#allocation4] sm:$0x1] %vm1141_vm4, %v1139_v17  ;;  %1263 = vmatpush.msra.mxu0 %v1243_v18  ;;  %v1671_v17 = vld [vmem:[%s2263_s11] ss:$0 sm:$0xff] }
 0x289   : > { %1264 = vmatpush.msra.mxu0 %v1242_v21 }
 0x28b   : > { %1265 = vmatpush.msra.mxu0 %v1241_v23 }
 0x28d   : > { %1266 = vmatpush.msra.mxu0 %v1240_v24 }
 0x28e   : > { %1565 = vmatmul.msk.f32.vlgmr.msra.gmra.mxu0 %vm876_vm1, %v1238_v22  ;;  %v1669_v27 = vld [vmem:[#allocation4] ss:$0 sm:$0xff] }
 0x2da   : > { %v1071_v45 = vpop.trf.xlu0 }
 0x2db   : > { %1560 = vmatmul.msk.f32.vlgmr.msra.gmra.mxu1 %vm642_vm0, %v1071_v45 }
 0x2e2   : > { %v1072_v46 = vpop.trf.xlu0 }
 0x2e3   : > { %1561 = vmatmul.msk.f32.gmra.mxu1 %vm642_vm0, %v1072_v46 }
 0x30b   : > { %v1268_v28 = vpop.f32.mrf.mxu0 }
 0x30c   : > { %v1269_v29 = vadd.f32 %v1669_v27, %v1268_v28 }
 0x30e   : > { %v1299_v30 = vsel %vm1132_vm3, %v1269_v29, -inf  ;;  %v1272_v40 = vsel %vm642_vm0, %v1269_v29, -inf }
 0x30f   : > { %1300 = vmax.xlane.f32.xlu2 %v1299_v30 }
 0x358   : > { %v1110_v0 = vpop.f32.mrf.mxu1 }
 0x359   : > { %1143 = vst.msk [vmem:[#allocation3 + $0x10] sm:$0xff] %vm876_vm1, %v1110_v0 }
 0x360   : > { %v1113_v1 = vpop.f32.mrf.mxu1  ;;  %v1327_v4 = vld [vmem:[#allocation3 + $0x10] sm:$0xff] }
 0x361   : > { %1144 = vst.msk [vmem:[#allocation3 + $0x18] sm:$0xff] %vm876_vm1, %v1113_v1 }
 0x368   : > { %v1328_v3 = vld [vmem:[#allocation3 + $0x18] sm:$0xff] }
 0x369   : > { %1348 = vmatpush.msrb.mxu1 %v1328_v3 }
 0x36b   : > { %1349 = vmatpush.msrb.mxu1 %v1327_v4 }
 0x382   : > { %v1301_v36 = vpop.xlane.xlu2 %1300 }
 0x383   : > { %v1302_v37 = vsub.f32 %v1269_v29, %v1301_v36 }
 0x385   : > { %v1303_v38 = vmul.f32 1.442695, %v1302_v37 }
 0x387   : > { %1672 = vpow2.f32 %v1303_v38 }
 0x38d   : > { %v1673_v39 = vpop.eup %1672 }
 0x38e   : > { %1306 = vrot.lane.b32.xlu1 %v1673_v39, %s1862_s4 }
 0x3b8   : > { %1273 = vmax.xlane.f32.xlu1 %v1272_v40 }
 0x400   : > { %v1307_v41 = vpop.permute.xlu1 %1306 }
 0x401   : > { %v1309_v42 = vsel %vm642_vm0, %v1307_v41, 0.0 }
 0x402   : > { %1310 = vadd.xlane.f32.xlu2 %v1309_v42 }
 0x42b   : > { %v1274_v47 = vpop.xlane.xlu1 %1273 }
 0x42c   : > { %v1275_v48 = vsub.f32 %v1269_v29, %v1274_v47 }
 0x42e   : > { %v1276_v49 = vmul.f32 1.442695, %v1275_v48 }
 0x430   : > { %1674 = vpow2.f32 %v1276_v49 }
 0x436   : > { %v1675_v50 = vpop.eup %1674 }
 0x437   : > { %v1278_v51 = vsel %vm642_vm0, %v1675_v50, 0.0 }
 0x438   : > { %1279 = vadd.xlane.f32.xlu0 %v1278_v51 }
 0x475   : > { %v1311_v52 = vpop.xlane.xlu2 %1310 }
 0x476   : > { %1676 = vrcp.f32 %v1311_v52  ;;  %v1323_v56 = vand.u32 2147483648, %v1311_v52  ;;  %v1321_v58 = vand.u32 2147483647, %v1311_v52  ;;  %vm1317_vm6 = vweird.f32 %v1311_v52 }
 0x478   : > { %v1324_v60 = vor.u32 1.1754944e-38, %v1323_v56  ;;  %vm1322_vm8 = vcmp.eq.f32.partialorder %v1321_v58, 8.507059e+37 }
 0x47c   : > { %v1677_v53 = vpop.eup %1676 }
 0x47d   : > { %v1313_v54 = vmul.f32 %v1677_v53, %v1311_v52  ;;  %vm1318_vm5 = vweird.f32 %v1677_v53 }
 0x47e   : > { %vm1319_vm7 = vmor %vm1317_vm6, %vm1318_vm5 }
 0x47f   : > { %v1314_v55 = vsub.f32 1.0, %v1313_v54 }
 0x481   : > { %v1315_v57 = vmul.f32 %v1677_v53, %v1314_v55 }
 0x483   : > { %v1316_v59 = vadd.f32 %v1677_v53, %v1315_v57 }
 0x485   : > { %v1320_v61 = vsel %vm1319_vm7, %v1677_v53, %v1316_v59 }
 0x486   : > { %v1325_v62 = vsel %vm1322_vm8, %v1324_v60, %v1320_v61 }
 0x487   : > { %v1326_v63 = vmul.f32 %v1673_v39, %v1325_v62 }
 0x489   : > { %1330 = vrot.lane.b32.xlu2 %v1326_v63, %s1862_s4  ;;  %s1569_s4 = sshll.u32 %s1848_s24, 3  ;;  %s1384_s24 = scalar_lea.sflag [#allocation7], %s2043_s20 }
 0x48a   : > { %s1395_s18 = scalar_lea.hbm %s2300_s21, %s1569_s4 }
 0x48b   : > { %s1399_s8 = sshll.u32 %s1395_s18, 4  ;;  %s1400_s8 = int_to_ptr.hbm [resolvable:$true] %s1399_s8 }
 0x48c   : > { %s1784_s7 = sshra.s32 %s1400_s8, 4  ;;  %s1785_s7 = int_to_ptr.hbm [resolvable:$true] %s1784_s7 }
 0x48d   : > { %s1786_s4 = scalar_lea.hbm %s1785_s7, 8  ;;  %p1791_p10 = scmp.lt.s32.totalorder %s1785_s7, %s2301_s12 }
 0x48e   : > { %p1787_p1 = scmp.ne.s32.totalorder %s1785_s7, %s1786_s4  ;;  %p1792_p12 = scmp.lt.s32.totalorder %s1790_s14, %s1786_s4 }
 0x490   : > { %p1788_p8 = pnand %p1787_p1, %p2023_p0  ;;  %p1793_p13 = por %p1792_p12, %p1791_p10 }
 0x492   : > { %p1789_p9 = pneg %p1788_p8 }
 0x494   : > { %p1794_p2 = pnand %p1793_p13, %p1789_p9 }
 0x4ab   : > { %v1280_v2 = vpop.xlane.xlu0 %1279 }
 0x4ac   : > { %1678 = vrcp.f32 %v1280_v2  ;;  %v1292_v8 = vand.u32 2147483648, %v1280_v2  ;;  %v1290_v10 = vand.u32 2147483647, %v1280_v2  ;;  %vm1286_vm10 = vweird.f32 %v1280_v2 }
 0x4ae   : > { %v1293_v12 = vor.u32 1.1754944e-38, %v1292_v8  ;;  %vm1291_vm12 = vcmp.eq.f32.partialorder %v1290_v10, 8.507059e+37 }
 0x4b2   : > { %v1679_v5 = vpop.eup %1678 }
 0x4b3   : > { %v1282_v6 = vmul.f32 %v1679_v5, %v1280_v2  ;;  %vm1287_vm9 = vweird.f32 %v1679_v5 }
 0x4b4   : > { %vm1288_vm11 = vmor %vm1286_vm10, %vm1287_vm9 }
 0x4b5   : > { %v1283_v7 = vsub.f32 1.0, %v1282_v6 }
 0x4b7   : > { %v1284_v9 = vmul.f32 %v1679_v5, %v1283_v7 }
 0x4b9   : > { %v1285_v11 = vadd.f32 %v1679_v5, %v1284_v9 }
 0x4bb   : > { %v1289_v13 = vsel %vm1288_vm11, %v1679_v5, %v1285_v11 }
 0x4bc   : > { %v1294_v14 = vsel %vm1291_vm12, %v1293_v12, %v1289_v13 }
 0x4bd   : > { %v1295_v15 = vmul.f32 %v1675_v50, %v1294_v14 }
 0x4bf   : > { %1567 = vmatmul.msk.f32.vlgmr.msrb.gmra.mxu2 %vm642_vm0, %v1295_v15 }
 0x4e3   : > { %v1331_v16 = vpop.permute.xlu2 %1330 }
 0x4e4   : > { %1566 = vmatmul.msk.f32.vlgmr.msrb.gmra.mxu1 %vm642_vm0, %v1331_v16 }
 0x542   : > { %v1374_v18 = vpop.f32.mrf.mxu2 }
 0x561   : > { %v1351_v19 = vpop.f32.mrf.mxu1 }
 0x562   : > { %v1375_v20 = vadd.f32 %v1374_v18, %v1351_v19 }
 0x564   : > { %v1381_v21 = vadd.f32 %v1671_v17, %v1375_v20 }
 0x566   : > { %1382 = vst.msk [vmem:[%s618_s19] sm:$0xff] %vm876_vm1, %v1381_v21 }
 0x567   : > { %1797 = shalt.err (!%p1794_p2)
}
 0x568   : > { %1584 = dma.vmem_to_hbm [thread:$0]  (%p2023_p0), %s1398_s6, 128, %s1400_s8, %s1384_s24  }
 0x569 PF: > { %s2302_s20 = sld [smem:[#allocation15_spill]]  ;;  %p1598_p4 = pnand %p1528_p6, %p2030_p5 }
 0x56b   : > { %p1599_p7 = pneg %p1598_p4 }
 0x56f   : > { %s1411_s30 = sand.u32 1, %s2302_s20  }
 0x570   : > { %s1412_s19 = scalar_lea.sflag [#allocation7], %s1411_s30 }
 0x571   : > { %1831 = dma.done.wait (%p1599_p7), %s1412_s19, 128  }
 0x572   : > { %1833 = vsyncadd (%p1599_p7), %s1412_s19, 4294967168  ;;  %s33_s26 = sadd.s32 1, %s1856_s26   ;;  %s2303_s16 = sld [smem:[#allocation16_spill]] }
 0x573   : > { %p30_p11 = scmp.ge.s32.totalorder %s33_s26, 4   ;;  %s2304_s21 = smov %s1840_s22 }
 0x574   : > { %s2305_s22 = smov %s1844_s23  ;;  %s2306_s23 = smov %s2028_s27 }
 0x575   : > { %s2307_s24 = smov %s1852_s25  ;;  %32 = sbr.rel (!%p30_p11) target bundleno = 17 (0x11), region = 147 }
 0x578   : > { %s2308_s25 = smov %s2303_s16 }
 0x57a   :  { %1418 = vsyncpa [#allocation6], 1 }
 0x57b   :  { %1420 = vsyncpa [#allocation6 + $0x1], 1 }
 0x57c   :  { %1421 = vsyncpa [#allocation9], 1 }
 0x57d   :  { %1422 = vsyncpa [#allocation7], 1 }
 0x57e   :  { %1424 = vsyncpa [#allocation7 + $0x1], 1 }

// kernel: tpu_custom_call.1
= control target key start
LH: loop header
LB: loop body
LE: loop exit
PB: predicated region body
PF: predicated region fallthrough
CT: control target
= control target key end

     0   :  { %s2252_s0 = inlined_call_operand.hbm [shape: f32[2,8,32], index: 0, kind: input, shape index: {}]   ;;  %s2253_s1 = inlined_call_operand.vmem [shape: f32[2,32,16], index: 1, kind: input, shape index: {}]   ;;  %s2254_s2 = inlined_call_operand.vmem [shape: f32[2,32,16], index: 2, kind: input, shape index: {}]   ;;  %s2255_s3 = inlined_call_operand.vmem [shape: f32[32,32], index: 3, kind: input, shape index: {}]   ;;  %s2256_s4 = inlined_call_operand.vmem [shape: f32[1,32], index: 4, kind: input, shape index: {}]   ;;  %s2257_s5 = inlined_call_operand.vmem [shape: f32[32,32], index: 5, kind: input, shape index: {}]   ;;  %s2258_s6 = inlined_call_operand.vmem [shape: f32[1,32], index: 6, kind: input, shape index: {}]   ;;  %s2259_s7 = inlined_call_operand.vmem [shape: f32[32,32], index: 7, kind: input, shape index: {}]   ;;  %s2260_s8 = inlined_call_operand.vmem [shape: f32[1,32], index: 8, kind: input, shape index: {}]   ;;  %s2261_s9 = inlined_call_operand.vmem [shape: f32[32,32], index: 9, kind: input, shape index: {}]   ;;  %s2262_s10 = inlined_call_operand.vmem [shape: f32[32,32], index: 10, kind: input, shape index: {}]   ;;  %s2263_s11 = inlined_call_operand.vmem [shape: f32[1,32], index: 11, kind: input, shape index: {}]   ;;  %s2264_s12 = inlined_call_operand.hbm [shape: f32[16,16], index: 12, kind: input, shape index: {}]   ;;  %s2265_s13 = inlined_call_operand.vmem [shape: f32[1,16], index: 13, kind: input, shape index: {}]   ;;  %s2266_s14 = inlined_call_operand.hbm [shape: f32[16,16], index: 14, kind: input, shape index: {}]   ;;  %s2267_s15 = inlined_call_operand.vmem [shape: f32[1,16], index: 15, kind: input, shape index: {}]   ;;  %s2268_s16 = inlined_call_operand.hbm [shape: f32[2,8,32], index: 16, kind: output, shape index: {}]  }
   0x1   :  { %2275 = sst [smem:[#allocation17_spill]] %s2252_s0 }
   0x2   :  { %2276 = sst [smem:[#allocation18_spill]] %s2256_s4 }
   0x3   :  { %2277 = sst [smem:[#allocation19_spill]] %s2257_s5 }
   0x4   :  { %2278 = sst [smem:[#allocation20_spill]] %s2258_s6 }
   0x5   :  { %2279 = sst [smem:[#allocation21_spill]] %s2259_s7 }
   0x6   :  { %2280 = sst [smem:[#allocation22_spill]] %s2260_s8 }
   0x7   :  { %2281 = sst [smem:[#allocation23_spill]] %s2264_s12 }
   0x8   :  { %2282 = sst [smem:[#allocation24_spill]] %s2266_s14 }
   0x9   :  { %2283 = sst [smem:[#allocation25_spill]] %s2268_s16 }
   0xa   :  { %21 = vsyncpa [#allocation6], 0 }
   0xb   :  { %23 = vsyncpa [#allocation6 + $0x1], 0 }
   0xc   :  { %24 = vsyncpa [#allocation9], 0 }
   0xd   :  { %25 = vsyncpa [#allocation7], 0 }
   0xe   :  { %27 = vsyncpa [#allocation7 + $0x1], 0  ;;  %s1949_s21 = smov 0   ;;  %s1951_s22 = smov 0  }
   0xf   :  { %s1953_s23 = smov 0   ;;  %s1955_s24 = smov 0  }
  0x10   :  { %s1957_s25 = smov 0   ;;  %s1959_s26 = smov 0  }
  0x11 LB: > { %2284 = sst [smem:[#allocation15_spill]] %s1836_s21  ;;  %s2269_s27 = sadd.s32 4294967295, %s1856_s26   ;;  %s1856_s26 = sphi %s1959_s26, %s33_s26   ;;  %s1852_s25 = sphi %s1957_s25, %s2308_s25   ;;  %s1848_s24 = sphi %s1955_s24, %s2307_s24   ;;  %s1844_s23 = sphi %s1953_s23, %s2306_s23   ;;  %s1840_s22 = sphi %s1951_s22, %s2305_s22   ;;  %s1836_s21 = sphi %s1949_s21, %s2304_s21  }
  0x12   : > { %p1525_p0 = scmp.ge.s32.totalorder %s1856_s26, 1  ;;  %p1983_p1 = scmp.eq.s32.totalorder %s2269_s27, 0 }
  0x13   : > { %p431_p2 = scmp.lt.s32.totalorder %s1856_s26, 3  ;;  %s2286_s12 = sld [smem:[#allocation23_spill]] }
  0x14   : > { %s1858_s18 = smov [#allocation8]   ;;  %p1528_p6 = scmp.ge.s32.totalorder %s1856_s26, 2 }
  0x15   : > { %p1991_p3 = pnand %p1525_p0, %p431_p2  ;;  %s471_s19 = sshll.u32 %s1858_s18, 4  ;;  %s472_s19 = int_to_ptr.vmem [resolvable:$true] %s471_s19 }
  0x16   : > { %s2288_s14 = sld [smem:[#allocation24_spill]]  ;;  %s1859_s27 = smov 128  }
  0x17   : > { %p1586_p4 = pneg %p1991_p3  ;;  %s1861_s18 = smov [#allocation10]  }
  0x18   : > { %s488_s16 = sshll.u32 %s1861_s18, 4  ;;  %s45_s8 = sadd.s32 1, %s1852_s25  ;;  %s489_s16 = int_to_ptr.vmem [resolvable:$true] %s488_s16 }
  0x19   : > { %s469_s0 = sshll.u32 %s2286_s12, 4  ;;  %p1587_p5 = pnand %p1586_p4, %p1983_p1  ;;  %s470_s0 = int_to_ptr.hbm [resolvable:$true] %s469_s0 }
  0x1a   : > { %s1860_s12 = smov 8   ;;  %s1524_s6 = sadd.s32 4294967294, %s1856_s26  }
  0x1b   : > { %1589 = dma.hbm_to_vmem [thread:$0]  (!%p1587_p5), %s470_s0, 256, %s472_s19, [#allocation9], %s1859_s27, %s1859_s27, %s1860_s12  }
  0x1c   : > { %s486_s30 = sshll.u32 %s2288_s14, 4  ;;  %p47_p7 = scmp.ge.s32.totalorder %s45_s8, 2  ;;  %s487_s30 = int_to_ptr.hbm [resolvable:$true] %s486_s30 }
  0x1d   : > { %1592 = dma.hbm_to_vmem [thread:$0]  (!%p1587_p5), %s487_s30, 256, %s489_s16, [#allocation9], %s1859_s27, %s1859_s27, %s1860_s12  }
  0x1e   : > { %s54_s20 = sadd.s32 1, %s1844_s23  ;;  %p61_p8 = scmp.ne.s32.totalorder %s1844_s23, %s1840_s22 }
  0x1f   : > { %s2310_s8 = smov (%p47_p7, %s45_s8), 0  ;;  %p62_p9 = scmp.eq.s32.totalorder %s1856_s26, 0 }
  0x20   : > { %2289 = sst [smem:[#allocation16_spill]] %s2310_s8  ;;  %p67_p10 = scmp.ne.s32.totalorder %s1840_s22, %s1836_s21 }
  0x21   : > { %s49_s0 = ssub.s32 %s1852_s25, %s2310_s8  ;;  %s2290_s19 = sadd.s32 4294967295, %s1856_s26  }
  0x22   : > { %p418_p11 = scmp.eq.s32.totalorder %s2290_s19, 1  ;;  %p52_p12 = scmp.eq.s32.totalorder %s49_s0, 0 }
  0x23   : > { %p2019_p13 = por %p1983_p1, %p67_p10  ;;  %p424_p2 = scmp.eq.s32.totalorder %s1524_s6, 1 }
  0x24   : > { %p2023_p0 = por %p418_p11, %p61_p8  ;;  %p63_p4 = por %p62_p9, %p61_p8 }
  0x25   : > { %s2028_s27 = scalar_select %p52_p12, %s1844_s23, %s54_s20  }
  0x26   : > { %p2030_p5 = por %p424_p2, %p67_p10  ;;  %s505_s30 = sand.u32 1, %s1844_s23  }
  0x27   : > { %s1530_s18 = sshll.u32 %s1852_s25, 3  ;;  %p1603_p7 = scmp.lt.s32.totalorder %s1856_s26, 2 }
  0x28   : > { %s1529_s0 = sshll.u32 %s505_s30, 3  ;;  %s2294_s8 = sld [smem:[#allocation17_spill]] }
  0x29   : > { %s509_s4 = scalar_lea.vmem [#allocation5], %s1529_s0  ;;  %p1594_p11 = pnand %p1603_p7, %p63_p4 }
  0x2a   : > { %s518_s5 = sshll.u32 %s509_s4, 4  ;;  %s506_s6 = scalar_lea.sflag [#allocation6], %s505_s30  ;;  %s519_s5 = int_to_ptr.vmem [resolvable:$true] %s518_s5 }
  0x2b   : > { %s2043_s20 = sand.u32 (!%p1991_p3), 1, %s1840_s22  }
  0x2c   : > { %543 = sbr.rel (%p1991_p3) target bundleno = 1385 (0x569), region = 84  ;;  %s1532_s14 = sshll.u32 (!%p1991_p3), %s2043_s20, 3 }
  0x2e   : > { %s514_s21 = scalar_lea.hbm %s2294_s8, %s1530_s18  ;;  %s546_s8 = scalar_lea.sflag (!%p1991_p3), [#allocation6], %s2043_s20 }
  0x2f   : > { %s516_s7 = sshll.u32 %s514_s21, 4  ;;  %s2049_s21 = scalar_lea.vmem (!%p1991_p3), [#allocation5], %s1532_s14  ;;  %s517_s7 = int_to_ptr.hbm [resolvable:$true] %s516_s7 }
  0x30   : > { %1596 = dma.hbm_to_vmem [thread:$0]  (!%p1594_p11), %s517_s7, 128, %s519_s5, %s506_s6  }
  0x31   : > { %1823 = dma.done.wait (%p2019_p13), %s546_s8, 128  }
  0x32   : > { %1825 = vsyncadd (%p2019_p13), %s546_s8, 4294967168 }
  0x33   : > { %1827 = dma.done.wait (%p1983_p1), [#allocation9], 512  }
  0x34   : > { %1829 = vsyncadd (%p1983_p1), [#allocation9], 4294966784  ;;  %p619_p3 = scmp.lt.s32.totalorder %s1848_s24, 1  ;;  %v675_v0 = vld [vmem:[#allocation10 + $0x8] sm:$0xff]  ;;  %v674_v1 = vld [vmem:[#allocation10] sm:$0xff]  ;;  %vm642_vm0 = vcmask 130048  }
  0x35   : > { %700 = vmatpush.msra.mxu1 %v675_v0  ;;  %v709_v3 = vld [vmem:[%s2262_s10] sm:$0xff]  ;;  %v636_v5 = vld [vmem:[#allocation8] sm:$0xff]  ;;  %v710_v8 = vld [vmem:[%s2262_s10 + $0x8] sm:$0xff]  ;;  %vm876_vm1 = vcmask 261120   ;;  %vm874_vm2 = vcmask 122880   ;;  %s2296_s19 = sld [smem:[#allocation18_spill]] }
  0x36   : > { %s620_s4 = scalar_select %p619_p3, %s1848_s24, 1  ;;  %711 = vxpose.xlu0.b32.start [1/2] (short) (narrow) %v709_v3, 32  ;;  %v637_v4 = vld [vmem:[#allocation8 + $0x8] sm:$0xff]  ;;  %v953_v13 = vld [vmem:[%s2262_s10 + $0x10] sm:$0xff]  ;;  %v1147_v29 = vld [vmem:[%s2255_s3 + $0x8] sm:$0xff]  ;;  %vm1132_vm3 = vcmask 261248  }
  0x37   : > { %701 = vmatpush.msra.mxu1 %v674_v1  ;;  %663 = vmatpush.msra.mxu0 %v637_v4  ;;  %v1662_v7 = vld [vmem:[%s2263_s11] ss:$0 sm:$0xff]  ;;  %v954_v14 = vld [vmem:[%s2262_s10 + $0x18] sm:$0xff]  ;;  %v1148_v27 = vld [vmem:[%s2255_s3 + $0x10] sm:$0xff]  ;;  %s2298_s7 = sld [smem:[#allocation20_spill]]  ;;  %vm1141_vm4 = vcmask 254080  }
  0x38   : > { %s1572_s5 = sshll.u32 %s620_s4, 5  ;;  %s1862_s4 = smov 112   ;;  %955 = vxpose.xlu2.b32.start [1/2] (short) (narrow) %v953_v13, 32  ;;  %v1663_v15 = vld [vmem:[%s2267_s15] ss:$0 sm:$0xff]  ;;  %v1149_v26 = vld [vmem:[%s2255_s3 + $0x18] sm:$0xff] }
  0x39   : > { %s2064_s30 = scalar_lea.vmem %s2254_s2, %s1572_s5  ;;  %s623_s0 = scalar_lea.vmem %s2253_s1, %s1572_s5  ;;  %664 = vmatpush.msra.mxu0 %v636_v5  ;;  %944 = vmatpush.msrb.mxu1 %v675_v0  ;;  %v1664_v19 = vld [vmem:[%s2265_s13] ss:$0 sm:$0xff]  ;;  %v808_v37 = vld [vmem:[%s2261_s9 + $0x8] sm:$0xff] }
  0x3a   : > { %v672_v2 = vld [vmem:[%s2064_s30] sm:$0xff]  ;;  %1029 = vrot.lane.b32.xlu1 %v1662_v7, %s1862_s4  ;;  %v673_v9 = vld [vmem:[%s2064_s30 + $0x8] sm:$0xff]  ;;  %v879_v11 = vld [vmem:[%s623_s0 + $0x10] sm:$0xff]  ;;  %s2297_s5 = sld [smem:[#allocation21_spill]] }
  0x3b   : > { %v634_v6 = vld [vmem:[%s623_s0] sm:$0xff]  ;;  %1542 = vmatmul.msk.f32.vlgmr.msra.gmra.mxu1 %vm642_vm0, %v672_v2  ;;  %907 = vmatpush.msrb.mxu0 %v637_v4  ;;  %v635_v10 = vld [vmem:[%s623_s0 + $0x8] sm:$0xff]  ;;  %v880_v12 = vld [vmem:[%s623_s0 + $0x18] sm:$0xff]  ;;  %s2295_s0 = sld [smem:[#allocation19_spill]] }
  0x3c   : > { %1540 = vmatmul.msk.f32.vlgmr.msra.gmra.mxu0 %vm642_vm0, %v634_v6  ;;  %945 = vmatpush.msrb.mxu1 %v674_v1  ;;  %v633_v25 = vld [vmem:[%s2263_s11] sm:$0x1]  ;;  %v1145_v42 = vld [vmem:[%s2049_s21] sm:$0xff]  ;;  %s2299_s12 = sld [smem:[#allocation22_spill]] }
  0x3d   : > { %908 = vmatpush.msrb.mxu0 %v636_v5  ;;  %v1665_v30 = vld [vmem:[%s2265_s13] ss:$0 sm:$0xff]  ;;  %s2300_s21 = sld [smem:[#allocation25_spill]] }
  0x3e   : > { %712 = vxpose.xlu0.b32.end [2/2] (short) (narrow) %v710_v8, 32  ;;  %v1146_v35 = vld [vmem:[%s2255_s3] sm:$0xff] }
  0x3f   : > { %v807_v38 = vld [vmem:[%s2261_s9] sm:$0xff] }
  0x40   : > { %956 = vxpose.xlu2.b32.end [2/2] (short) (narrow) %v954_v14, 32  ;;  %v1666_v57 = vld [vmem:[%s2296_s19] ss:$0 sm:$0xff]  ;;  %v1212_v61 = vld [vmem:[%s2297_s5 + $0x18] sm:$0xff]  ;;  %v1211_v62 = vld [vmem:[%s2297_s5 + $0x10] sm:$0xff]  ;;  %s1863_s19 = smov 16  }
  0x41   : > { %v1181_v44 = vld [vmem:[%s2295_s0 + $0x18] sm:$0xff]  ;;  %v1180_v45 = vld [vmem:[%s2295_s0 + $0x10] sm:$0xff]  ;;  %v1179_v47 = vld [vmem:[%s2295_s0 + $0x8] sm:$0xff] }
  0x42   : > { %v1178_v48 = vld [vmem:[%s2295_s0] sm:$0xff]  ;;  %v1210_v63 = vld [vmem:[%s2297_s5 + $0x8] sm:$0xff] }
  0x43   : > { %1543 = vmatmul.msk.f32.gmra.mxu1 %vm642_vm0, %v673_v9  ;;  %v1209_v0 = vld [vmem:[%s2297_s5] sm:$0xff] }
  0x44   : > { %1541 = vmatmul.msk.f32.gmra.mxu0 %vm642_vm0, %v635_v10  ;;  %v1667_v8 = vld [vmem:[%s2298_s7] ss:$0 sm:$0xff] }
  0x4c   : > { %1551 = vmatmul.msk.f32.vlgmr.msrb.gmra.mxu0 %vm642_vm0, %v879_v11 }
  0x54   : > { %1552 = vmatmul.msk.f32.gmra.mxu0 %vm642_vm0, %v880_v12 }
  0xac   : > { %v1030_v34 = vpop.permute.xlu1 %1029 }
  0xb8   : > { %v703_v16 = vpop.f32.mrf.mxu1 }
  0xb9   : > { %v704_v17 = vadd.f32 %v1663_v15, %v703_v16  ;;  %v666_v18 = vpop.f32.mrf.mxu0 }
  0xba   : > { %v667_v23 = vadd.f32 %v1664_v19, %v666_v18 }
  0xbb   : > { %809 = vxpose.xlu1.b32.start [1/2] (short) (narrow) %v704_v17, 16 }
  0xc0   : > { %v706_v20 = vpop.f32.mrf.mxu1 }
  0xc1   : > { %v707_v21 = vadd.f32 %v1663_v15, %v706_v20  ;;  %v669_v22 = vpop.f32.mrf.mxu0 }
  0xc2   : > { %v670_v24 = vadd.f32 %v1664_v19, %v669_v22  ;;  %v1668_v19 = vld [vmem:[%s2299_s12] ss:$0 sm:$0xff]  ;;  %s2301_s12 = smov %s2300_s21 }
  0xc3   : > { %810 = vxpose.xlu1.b32.end [2/2] (short) (narrow) %v707_v21, 16 }
  0xc4   : > { %769 = vmatpush.msra.mxu2 %v670_v24  ;;  %801 = vmatpush.msra.mxu3 %v670_v24 }
  0xc6   : > { %770 = vmatpush.msra.mxu2 %v667_v23  ;;  %802 = vmatpush.msra.mxu3 %v667_v23 }
  0xc7   : > { %1548 = vmatmul.msk.f32.vlgmr.msra.gmra.mxu3 %vm642_vm0, %v633_v25  ;;  %v916_v25 = vld [vmem:[%s2064_s30 + $0x10] sm:$0xff] }
  0xc8   : > { %1170 = vmatpush.msrb.mxu2 %v1149_v26  ;;  %861 = vmatpush.msrb.mxu3 %v808_v37  ;;  %v917_v26 = vld [vmem:[%s2064_s30 + $0x18] sm:$0xff] }
  0xc9   : > { %v910_v28 = vpop.f32.mrf.mxu0  ;;  %1553 = vmatmul.msk.f32.vlgmr.msrb.gmra.mxu1 %vm642_vm0, %v916_v25 }
  0xca   : > { %1171 = vmatpush.msrb.mxu2 %v1148_v27  ;;  %v911_v32 = vadd.f32 %v1665_v30, %v910_v28  ;;  %862 = vmatpush.msrb.mxu3 %v807_v38 }
  0xcc   : > { %1172 = vmatpush.msrb.mxu2 %v1147_v29 }
  0xce   : > { %1173 = vmatpush.msrb.mxu2 %v1146_v35 }
  0xd1   : > { %v913_v31 = vpop.f32.mrf.mxu0  ;;  %v971_v50 = vpop.trf.xlu2  ;;  %1554 = vmatmul.msk.f32.gmra.mxu1 %vm642_vm0, %v917_v26 }
  0xd2   : > { %v914_v33 = vadd.f32 %v1665_v30, %v913_v31  ;;  %v1670_v31 = vld [vmem:[%s2267_s15] ss:$0 sm:$0xff] }
  0xd4   : > { %1047 = vmatpush.msra.mxu0 %v914_v33  ;;  %1013 = vmatpush.msra.mxu3 %v914_v33 }
  0xd6   : > { %1048 = vmatpush.msra.mxu0 %v911_v32  ;;  %1014 = vmatpush.msra.mxu3 %v911_v32 }
  0xd7   : > { %1559 = vmatmul.msk.f32.vlgmr.msra.gmra.mxu0 %vm642_vm0, %v1030_v34 }
  0xd8   : > { %1201 = vmatpush.msrb.mxu0 %v1181_v44  ;;  %v1053_v44 = vld [vmem:[%s2261_s9 + $0x10] sm:$0xff] }
  0xd9   : > { %v972_v54 = vpop.trf.xlu2 }
  0xda   : > { %v727_v36 = vpop.trf.xlu0  ;;  %1202 = vmatpush.msrb.mxu0 %v1180_v45 }
  0xdb   : > { %1544 = vmatmul.msk.f32.vlgmr.msra.gmra.mxu2 %vm642_vm0, %v727_v36 }
  0xdc   : > { %1203 = vmatpush.msrb.mxu0 %v1179_v47  ;;  %1232 = vmatpush.msra.mxu2 %v1212_v61 }
  0xde   : > { %1204 = vmatpush.msrb.mxu0 %v1178_v48  ;;  %1233 = vmatpush.msra.mxu2 %v1211_v62 }
  0xe0   : > { %1234 = vmatpush.msra.mxu2 %v1210_v63 }
  0xe1   : > { %v973_v56 = vpop.trf.xlu2 }
  0xe2   : > { %v728_v39 = vpop.trf.xlu0  ;;  %1235 = vmatpush.msra.mxu2 %v1209_v0 }
  0xe3   : > { %1545 = vmatmul.msk.f32.gmra.mxu2 %vm642_vm0, %v728_v39 }
  0xe9   : > { %v974_v60 = vpop.trf.xlu2 }
  0xea   : > { %v729_v40 = vpop.trf.xlu0 }
  0xeb   : > { %1546 = vmatmul.msk.f32.gmra.mxu2 %vm642_vm0, %v729_v40 }
  0xf2   : > { %v730_v41 = vpop.trf.xlu0 }
  0xf3   : > { %1547 = vmatmul.msk.f32.gmra.mxu2 %vm642_vm0, %v730_v41 }
  0xfb   : > { %1562 = vmatmul.msk.f32.vlgmr.msrb.gmra.mxu2 %vm876_vm1, %v1145_v42 }
 0x146   : > { %v947_v32 = vpop.f32.mrf.mxu1 }
 0x147   : > { %v948_v33 = vadd.f32 %v1670_v31, %v947_v32 }
 0x14a   : > { %v804_v51 = vpop.f32.mrf.mxu3 }
 0x14b   : > { %875 = vst.msk [vmem:[#allocation4] sm:$0x1] %vm874_vm2, %v804_v51 }
 0x14e   : > { %v950_v34 = vpop.f32.mrf.mxu1 }
 0x14f   : > { %v951_v35 = vadd.f32 %v1670_v31, %v950_v34 }
 0x154   : > { %v1050_v6 = vpop.f32.mrf.mxu0 }
 0x15e   : > { %v772_v46 = vpop.f32.mrf.mxu2 }
 0x15f   : > { %v825_v43 = vpop.trf.xlu1  ;;  %870 = vst.msk [vmem:[#allocation2] sm:$0xff] %vm642_vm0, %v772_v46 }
 0x160   : > { %1549 = vmatmul.msk.f32.vlgmr.msrb.gmra.mxu3 %vm642_vm0, %v825_v43  ;;  %v1054_v43 = vld [vmem:[%s2261_s9 + $0x18] sm:$0xff] }
 0x161   : > { %1107 = vmatpush.msra.mxu1 %v1054_v43 }
 0x163   : > { %1108 = vmatpush.msra.mxu1 %v1053_v44 }
 0x166   : > { %v775_v52 = vpop.f32.mrf.mxu2 }
 0x167   : > { %v826_v49 = vpop.trf.xlu1  ;;  %871 = vst.msk [vmem:[#allocation2 + $0x8] sm:$0xff] %vm642_vm0, %v775_v52 }
 0x168   : > { %1550 = vmatmul.msk.f32.gmra.mxu3 %vm642_vm0, %v826_v49 }
 0x16e   : > { %v778_v53 = vpop.f32.mrf.mxu2 }
 0x16f   : > { %872 = vst.msk [vmem:[#allocation2 + $0x10] sm:$0xff] %vm642_vm0, %v778_v53 }
 0x170   : > { %1555 = vmatmul.msk.f32.vlgmr.msra.gmra.mxu3 %vm642_vm0, %v971_v50 }
 0x176   : > { %v781_v55 = vpop.f32.mrf.mxu2 }
 0x177   : > { %873 = vst.msk [vmem:[#allocation2 + $0x18] sm:$0xff] %vm642_vm0, %v781_v55 }
 0x178   : > { %1556 = vmatmul.msk.f32.gmra.mxu3 %vm642_vm0, %v972_v54 }
 0x17e   : > { %v1175_v58 = vpop.f32.mrf.mxu2 }
 0x17f   : > { %v1176_v59 = vadd.f32 %v1666_v57, %v1175_v58 }
 0x180   : > { %1557 = vmatmul.msk.f32.gmra.mxu3 %vm642_vm0, %v973_v56 }
 0x181   : > { %1563 = vmatmul.msk.f32.vlgmr.msrb.gmra.mxu0 %vm876_vm1, %v1176_v59 }
 0x188   : > { %1558 = vmatmul.msk.f32.gmra.mxu3 %vm642_vm0, %v974_v60 }
 0x1e3   : > { %v864_v1 = vpop.f32.mrf.mxu3 }
 0x1e4   : > { %877 = vst.msk [vmem:[#allocation3] sm:$0xff] %vm876_vm1, %v864_v1 }
 0x1eb   : > { %v867_v2 = vpop.f32.mrf.mxu3  ;;  %v1296_v5 = vld [vmem:[#allocation3] sm:$0xff] }
 0x1ec   : > { %878 = vst.msk [vmem:[#allocation3 + $0x8] sm:$0xff] %vm876_vm1, %v867_v2 }
 0x1f3   : > { %v1016_v3 = vpop.f32.mrf.mxu3  ;;  %v1297_v4 = vld [vmem:[#allocation3 + $0x8] sm:$0xff] }
 0x1f4   : > { %1371 = vmatpush.msrb.mxu2 %v1297_v4 }
 0x1f6   : > { %1372 = vmatpush.msrb.mxu2 %v1296_v5 }
 0x1fb   : > { %v1019_v7 = vpop.f32.mrf.mxu3 }
 0x1fc   : > { %1122 = vrot.lane.b32.xlu1 %v1019_v7, %s1863_s19 }
 0x1fe   : > { %v1206_v9 = vpop.f32.mrf.mxu0 }
 0x1ff   : > { %v1207_v10 = vadd.f32 %v1667_v8, %v1206_v9 }
 0x201   : > { %1564 = vmatmul.msk.f32.vlgmr.msra.gmra.mxu2 %vm876_vm1, %v1207_v10 }
 0x203   : > { %v1022_v11 = vpop.f32.mrf.mxu3 }
 0x204   : > { %1124 = vrot.lane.b32.xlu2 %v1022_v11, %s1863_s19 }
 0x20b   : > { %v1025_v12 = vpop.f32.mrf.mxu3 }
 0x20c   : > { %1120 = vrot.lane.b32.xlu2 %v1016_v3, %s1863_s19  ;;  %1126 = vrot.lane.b32.xlu0 %v1025_v12, %s1863_s19 }
 0x214   : > { %1138 = vrot.lane.b32.xlu0 %v1050_v6, %s1863_s19  ;;  %s618_s19 = scalar_lea.vmem [#allocation11], %s1532_s14  ;;  %s1790_s14 = scalar_lea.hbm %s2301_s12, 16 }
 0x215   : > { %s1397_s6 = sshll.u32 %s618_s19, 4  ;;  %s1398_s6 = int_to_ptr.vmem [resolvable:$true] %s1397_s6 }
 0x236   : > { %1055 = vxpose.xlu0.b32.start [1/2] (short) (narrow) %v948_v33, 16 }
 0x23e   : > { %1056 = vxpose.xlu0.b32.end [2/2] (short) (narrow) %v951_v35, 16 }
 0x25e   : > { %v1125_v13 = vpop.permute.xlu2 %1124 }
 0x25f   : > { %1135 = vst.msk [vmem:[#allocation2 + $0x10] sm:$0xff] %vm1132_vm3, %v1125_v13 }
 0x266   : > { %v1121_v14 = vpop.permute.xlu2 %1120  ;;  %v1242_v21 = vld [vmem:[#allocation2 + $0x10] sm:$0xff] }
 0x267   : > { %1133 = vst.msk [vmem:[#allocation2] sm:$0xff] %vm1132_vm3, %v1121_v14 }
 0x26e   : > { %v1123_v15 = vpop.permute.xlu1 %1122  ;;  %v1240_v24 = vld [vmem:[#allocation2] sm:$0xff] }
 0x26f   : > { %1134 = vst.msk [vmem:[#allocation2 + $0x8] sm:$0xff] %vm1132_vm3, %v1123_v15 }
 0x276   : > { %v1241_v23 = vld [vmem:[#allocation2 + $0x8] sm:$0xff] }
 0x27e   : > { %v1127_v16 = vpop.permute.xlu0 %1126 }
 0x27f   : > { %1136 = vst.msk [vmem:[#allocation2 + $0x18] sm:$0xff] %vm1132_vm3, %v1127_v16 }
 0x284   : > { %v1237_v20 = vpop.f32.mrf.mxu2 }
 0x285   : > { %v1238_v22 = vadd.f32 %v1668_v19, %v1237_v20 }
 0x286   : > { %v1139_v17 = vpop.permute.xlu0 %1138  ;;  %v1243_v18 = vld [vmem:[#allocation2 + $0x18] sm:$0xff] }
 0x287   : > { %1142 = vst.msk [vmem:[#allocation4] sm:$0x1] %vm1141_vm4, %v1139_v17  ;;  %1263 = vmatpush.msra.mxu0 %v1243_v18  ;;  %v1671_v17 = vld [vmem:[%s2263_s11] ss:$0 sm:$0xff] }
 0x289   : > { %1264 = vmatpush.msra.mxu0 %v1242_v21 }
 0x28b   : > { %1265 = vmatpush.msra.mxu0 %v1241_v23 }
 0x28d   : > { %1266 = vmatpush.msra.mxu0 %v1240_v24 }
 0x28e   : > { %1565 = vmatmul.msk.f32.vlgmr.msra.gmra.mxu0 %vm876_vm1, %v1238_v22  ;;  %v1669_v27 = vld [vmem:[#allocation4] ss:$0 sm:$0xff] }
 0x2da   : > { %v1071_v45 = vpop.trf.xlu0 }
 0x2db   : > { %1560 = vmatmul.msk.f32.vlgmr.msra.gmra.mxu1 %vm642_vm0, %v1071_v45 }
 0x2e2   : > { %v1072_v46 = vpop.trf.xlu0 }
 0x2e3   : > { %1561 = vmatmul.msk.f32.gmra.mxu1 %vm642_vm0, %v1072_v46 }
 0x30b   : > { %v1268_v28 = vpop.f32.mrf.mxu0 }
 0x30c   : > { %v1269_v29 = vadd.f32 %v1669_v27, %v1268_v28 }
 0x30e   : > { %v1299_v30 = vsel %vm1132_vm3, %v1269_v29, -inf  ;;  %v1272_v40 = vsel %vm642_vm0, %v1269_v29, -inf }
 0x30f   : > { %1300 = vmax.xlane.f32.xlu2 %v1299_v30 }
 0x358   : > { %v1110_v0 = vpop.f32.mrf.mxu1 }
 0x359   : > { %1143 = vst.msk [vmem:[#allocation3 + $0x10] sm:$0xff] %vm876_vm1, %v1110_v0 }
 0x360   : > { %v1113_v1 = vpop.f32.mrf.mxu1  ;;  %v1327_v4 = vld [vmem:[#allocation3 + $0x10] sm:$0xff] }
 0x361   : > { %1144 = vst.msk [vmem:[#allocation3 + $0x18] sm:$0xff] %vm876_vm1, %v1113_v1 }
 0x368   : > { %v1328_v3 = vld [vmem:[#allocation3 + $0x18] sm:$0xff] }
 0x369   : > { %1348 = vmatpush.msrb.mxu1 %v1328_v3 }
 0x36b   : > { %1349 = vmatpush.msrb.mxu1 %v1327_v4 }
 0x382   : > { %v1301_v36 = vpop.xlane.xlu2 %1300 }
 0x383   : > { %v1302_v37 = vsub.f32 %v1269_v29, %v1301_v36 }
 0x385   : > { %v1303_v38 = vmul.f32 1.442695, %v1302_v37 }
 0x387   : > { %1672 = vpow2.f32 %v1303_v38 }
 0x38d   : > { %v1673_v39 = vpop.eup %1672 }
 0x38e   : > { %1306 = vrot.lane.b32.xlu1 %v1673_v39, %s1862_s4 }
 0x3b8   : > { %1273 = vmax.xlane.f32.xlu1 %v1272_v40 }
 0x400   : > { %v1307_v41 = vpop.permute.xlu1 %1306 }
 0x401   : > { %v1309_v42 = vsel %vm642_vm0, %v1307_v41, 0.0 }
 0x402   : > { %1310 = vadd.xlane.f32.xlu2 %v1309_v42 }
 0x42b   : > { %v1274_v47 = vpop.xlane.xlu1 %1273 }
 0x42c   : > { %v1275_v48 = vsub.f32 %v1269_v29, %v1274_v47 }
 0x42e   : > { %v1276_v49 = vmul.f32 1.442695, %v1275_v48 }
 0x430   : > { %1674 = vpow2.f32 %v1276_v49 }
 0x436   : > { %v1675_v50 = vpop.eup %1674 }
 0x437   : > { %v1278_v51 = vsel %vm642_vm0, %v1675_v50, 0.0 }
 0x438   : > { %1279 = vadd.xlane.f32.xlu0 %v1278_v51 }
 0x475   : > { %v1311_v52 = vpop.xlane.xlu2 %1310 }
 0x476   : > { %1676 = vrcp.f32 %v1311_v52  ;;  %v1323_v56 = vand.u32 2147483648, %v1311_v52  ;;  %v1321_v58 = vand.u32 2147483647, %v1311_v52  ;;  %vm1317_vm6 = vweird.f32 %v1311_v52 }
 0x478   : > { %v1324_v60 = vor.u32 1.1754944e-38, %v1323_v56  ;;  %vm1322_vm8 = vcmp.eq.f32.partialorder %v1321_v58, 8.507059e+37 }
 0x47c   : > { %v1677_v53 = vpop.eup %1676 }
 0x47d   : > { %v1313_v54 = vmul.f32 %v1677_v53, %v1311_v52  ;;  %vm1318_vm5 = vweird.f32 %v1677_v53 }
 0x47e   : > { %vm1319_vm7 = vmor %vm1317_vm6, %vm1318_vm5 }
 0x47f   : > { %v1314_v55 = vsub.f32 1.0, %v1313_v54 }
 0x481   : > { %v1315_v57 = vmul.f32 %v1677_v53, %v1314_v55 }
 0x483   : > { %v1316_v59 = vadd.f32 %v1677_v53, %v1315_v57 }
 0x485   : > { %v1320_v61 = vsel %vm1319_vm7, %v1677_v53, %v1316_v59 }
 0x486   : > { %v1325_v62 = vsel %vm1322_vm8, %v1324_v60, %v1320_v61 }
 0x487   : > { %v1326_v63 = vmul.f32 %v1673_v39, %v1325_v62 }
 0x489   : > { %1330 = vrot.lane.b32.xlu2 %v1326_v63, %s1862_s4  ;;  %s1569_s4 = sshll.u32 %s1848_s24, 3  ;;  %s1384_s24 = scalar_lea.sflag [#allocation7], %s2043_s20 }
 0x48a   : > { %s1395_s18 = scalar_lea.hbm %s2300_s21, %s1569_s4 }
 0x48b   : > { %s1399_s8 = sshll.u32 %s1395_s18, 4  ;;  %s1400_s8 = int_to_ptr.hbm [resolvable:$true] %s1399_s8 }
 0x48c   : > { %s1784_s7 = sshra.s32 %s1400_s8, 4  ;;  %s1785_s7 = int_to_ptr.hbm [resolvable:$true] %s1784_s7 }
 0x48d   : > { %s1786_s4 = scalar_lea.hbm %s1785_s7, 8  ;;  %p1791_p10 = scmp.lt.s32.totalorder %s1785_s7, %s2301_s12 }
 0x48e   : > { %p1787_p1 = scmp.ne.s32.totalorder %s1785_s7, %s1786_s4  ;;  %p1792_p12 = scmp.lt.s32.totalorder %s1790_s14, %s1786_s4 }
 0x490   : > { %p1788_p8 = pnand %p1787_p1, %p2023_p0  ;;  %p1793_p13 = por %p1792_p12, %p1791_p10 }
 0x492   : > { %p1789_p9 = pneg %p1788_p8 }
 0x494   : > { %p1794_p2 = pnand %p1793_p13, %p1789_p9 }
 0x4ab   : > { %v1280_v2 = vpop.xlane.xlu0 %1279 }
 0x4ac   : > { %1678 = vrcp.f32 %v1280_v2  ;;  %v1292_v8 = vand.u32 2147483648, %v1280_v2  ;;  %v1290_v10 = vand.u32 2147483647, %v1280_v2  ;;  %vm1286_vm10 = vweird.f32 %v1280_v2 }
 0x4ae   : > { %v1293_v12 = vor.u32 1.1754944e-38, %v1292_v8  ;;  %vm1291_vm12 = vcmp.eq.f32.partialorder %v1290_v10, 8.507059e+37 }
 0x4b2   : > { %v1679_v5 = vpop.eup %1678 }
 0x4b3   : > { %v1282_v6 = vmul.f32 %v1679_v5, %v1280_v2  ;;  %vm1287_vm9 = vweird.f32 %v1679_v5 }
 0x4b4   : > { %vm1288_vm11 = vmor %vm1286_vm10, %vm1287_vm9 }
 0x4b5   : > { %v1283_v7 = vsub.f32 1.0, %v1282_v6 }
 0x4b7   : > { %v1284_v9 = vmul.f32 %v1679_v5, %v1283_v7 }
 0x4b9   : > { %v1285_v11 = vadd.f32 %v1679_v5, %v1284_v9 }
 0x4bb   : > { %v1289_v13 = vsel %vm1288_vm11, %v1679_v5, %v1285_v11 }
 0x4bc   : > { %v1294_v14 = vsel %vm1291_vm12, %v1293_v12, %v1289_v13 }
 0x4bd   : > { %v1295_v15 = vmul.f32 %v1675_v50, %v1294_v14 }
 0x4bf   : > { %1567 = vmatmul.msk.f32.vlgmr.msrb.gmra.mxu2 %vm642_vm0, %v1295_v15 }
 0x4e3   : > { %v1331_v16 = vpop.permute.xlu2 %1330 }
 0x4e4   : > { %1566 = vmatmul.msk.f32.vlgmr.msrb.gmra.mxu1 %vm642_vm0, %v1331_v16 }
 0x542   : > { %v1374_v18 = vpop.f32.mrf.mxu2 }
 0x561   : > { %v1351_v19 = vpop.f32.mrf.mxu1 }
 0x562   : > { %v1375_v20 = vadd.f32 %v1374_v18, %v1351_v19 }
 0x564   : > { %v1381_v21 = vadd.f32 %v1671_v17, %v1375_v20 }
 0x566   : > { %1382 = vst.msk [vmem:[%s618_s19] sm:$0xff] %vm876_vm1, %v1381_v21 }
 0x567   : > { %1797 = shalt.err (!%p1794_p2)
}
 0x568   : > { %1584 = dma.vmem_to_hbm [thread:$0]  (%p2023_p0), %s1398_s6, 128, %s1400_s8, %s1384_s24  }
 0x569 PF: > { %s2302_s20 = sld [smem:[#allocation15_spill]]  ;;  %p1598_p4 = pnand %p1528_p6, %p2030_p5 }
 0x56b   : > { %p1599_p7 = pneg %p1598_p4 }
 0x56f   : > { %s1411_s30 = sand.u32 1, %s2302_s20  }
 0x570   : > { %s1412_s19 = scalar_lea.sflag [#allocation7], %s1411_s30 }
 0x571   : > { %1831 = dma.done.wait (%p1599_p7), %s1412_s19, 128  }
 0x572   : > { %1833 = vsyncadd (%p1599_p7), %s1412_s19, 4294967168  ;;  %s33_s26 = sadd.s32 1, %s1856_s26   ;;  %s2303_s16 = sld [smem:[#allocation16_spill]] }
 0x573   : > { %p30_p11 = scmp.ge.s32.totalorder %s33_s26, 4   ;;  %s2304_s21 = smov %s1840_s22 }
 0x574   : > { %s2305_s22 = smov %s1844_s23  ;;  %s2306_s23 = smov %s2028_s27 }
 0x575   : > { %s2307_s24 = smov %s1852_s25  ;;  %32 = sbr.rel (!%p30_p11) target bundleno = 17 (0x11), region = 147 }
 0x578   : > { %s2308_s25 = smov %s2303_s16 }
 0x57a   :  { %1418 = vsyncpa [#allocation6], 1 }
 0x57b   :  { %1420 = vsyncpa [#allocation6 + $0x1], 1 }
 0x57c   :  { %1421 = vsyncpa [#allocation9], 1 }
 0x57d   :  { %1422 = vsyncpa [#allocation7], 1 }
 0x57e   :  { %1424 = vsyncpa [#allocation7 + $0x1], 1 }

</bundles_post_ra>
